<compile_context>
chip_gen: v6e
topology: v6e:2x2x1
jax: 0.10.0
libtpu: 0.0.40
codegen_flags: <defaults>
</compile_context>

<pallas_src>
import jax
import jax.numpy as jnp
from jax import lax
from jax.experimental import pallas as pl
from jax.experimental.pallas import tpu as pltpu


def _round_up(x, m):
    return ((x + m - 1) // m) * m


def _pick_tm(m, cap=512):
    """Largest tile (multiple of 16 for bf16 sublane packing) that still gives >=2
    grid steps when the layer is big enough; min 16."""
    half = _round_up(-(-m // 2), 16)
    return max(16, min(cap, half))


def _conv_mm_elu_kernel(p_ref, w_ref, b_ref, o_ref):
    # One tile of the im2col matmul: (TM, K)bf16 @ (K, Cout)bf16 -> f32 accumulate,
    # + bias (f32), ELU(alpha=1) in f32, store in o_ref.dtype.
    acc = jnp.dot(p_ref[...], w_ref[...], preferred_element_type=jnp.float32)
    acc = acc + b_ref[...]
    neg = jnp.exp(jnp.minimum(acc, 0.0)) - 1.0  # clamped: no overflow in dead branch
    o_ref[...] = jnp.where(acc > 0.0, acc, neg).astype(o_ref.dtype)


def conv4s2_elu(x_nhwc, w_hwio, b, *, out_dtype=jnp.bfloat16):
    """Valid Conv2d(kernel=4, stride=2) + bias + ELU as an im2col matmul on the MXU.

    x_nhwc: (N, H, W, Cin); w_hwio: (4, 4, Cin, Cout) f32; b: (Cout,) f32.
    Returns (N, Ho, Wo, Cout) in out_dtype.
    """
    N, H, W, C = x_nhwc.shape
    KH, KW, _, Cout = w_hwio.shape
    S = 2
    Ho = (H - KH) // S + 1
    Wo = (W - KW) // S + 1

    # Pad Cin to a multiple of 8 so K = 16 * C_pad is lane-aligned (layer 1: 48 -> 128).
    C_pad = _round_up(C, 8)
    if C_pad != C:
        x_nhwc = jnp.pad(x_nhwc, ((0, 0), (0, 0), (0, 0), (0, C_pad - C)))
        w_hwio = jnp.pad(w_hwio, ((0, 0), (0, 0), (0, C_pad - C), (0, 0)))

    # bf16 MXU operands; accumulation stays f32 inside the kernel.
    x_nhwc = x_nhwc.astype(jnp.bfloat16)

    # im2col (wrapper-side glue): last-axis order (kh, kw, cin) matches
    # w_hwio.reshape(16 * C_pad, Cout).
    cols = []
    for i in range(KH):
        for j in range(KW):
            cols.append(x_nhwc[:, i:i + S * Ho:S, j:j + S * Wo:S, :])
    K = KH * KW * C_pad
    M = N * Ho * Wo
    patches = jnp.concatenate(cols, axis=-1).reshape(M, K)

    tm = _pick_tm(M)
    n_tiles = -(-M // tm)
    M_pad = n_tiles * tm
    if M_pad != M:
        patches = jnp.pad(patches, ((0, M_pad - M), (0, 0)))

    w2d = w_hwio.reshape(K, Cout).astype(jnp.bfloat16)
    b2d = b.reshape(1, Cout).astype(jnp.float32)

    out = pl.pallas_call(
        _conv_mm_elu_kernel,
        out_shape=jax.ShapeDtypeStruct((M_pad, Cout), out_dtype),
        grid=(n_tiles,),
        in_specs=[
            pl.BlockSpec((tm, K), lambda i: (i, 0)),
            pl.BlockSpec((K, Cout), lambda i: (0, 0)),   # resident across grid steps
            pl.BlockSpec((1, Cout), lambda i: (0, 0)),   # resident across grid steps
        ],
        out_specs=pl.BlockSpec((tm, Cout), lambda i: (i, 0)),
        compiler_params=pltpu.CompilerParams(
            dimension_semantics=("parallel",),
            vmem_limit_bytes=32 * 1024 * 1024),
    )(patches, w2d, b2d)

    return out[:M].reshape(N, Ho, Wo, Cout)


def init_vis_encoder_params(key, in_channels, conv_hidden=32):
    """Deterministic synthetic params. PyTorch Conv2d shapes: W (Cout, Cin, 4, 4), b (Cout,)."""
    chans = [in_channels, conv_hidden, 2 * conv_hidden, 4 * conv_hidden, 8 * conv_hidden]
    params = []
    for l in range(4):
        key, kw, kb = jax.random.split(key, 3)
        cin, cout = chans[l], chans[l + 1]
        bound = 1.0 / float(jnp.sqrt(jnp.float32(cin * 16)))
        w = jax.random.uniform(kw, (cout, cin, 4, 4), jnp.float32, -bound, bound)
        b = jax.random.uniform(kb, (cout,), jnp.float32, -bound, bound)
        params.append((w, b))
    return params


def vis_encoder_forward(params, obs_nchw):
    """Pallas implementation of VisEncoder.forward. obs: (N, C, 64, 64) NCHW."""
    assert obs_nchw.shape[-2:] == (64, 64)
    x = jnp.transpose(obs_nchw, (0, 2, 3, 1))  # NCHW -> NHWC
    n_layers = len(params)
    for l, (w, b) in enumerate(params):
        w_hwio = jnp.transpose(w, (2, 3, 1, 0))  # OIHW -> (KH, KW, Cin, Cout)
        out_dtype = jnp.float32 if l == n_layers - 1 else jnp.bfloat16
        x = conv4s2_elu(x, w_hwio, b, out_dtype=out_dtype)
    # norm_layer is Identity in the reference module -> nothing to do.
    # nn.Flatten on the NCHW conv output (channel-major ordering):
    x_nchw = jnp.transpose(x, (0, 3, 1, 2))
    return x_nchw.reshape(x_nchw.shape[0], -1)


def vis_encoder_ref(params, obs_nchw):
    """Pure-JAX f32 reference (matches the PyTorch module semantics)."""
    x = obs_nchw
    for w, b in params:
        x = lax.conv_general_dilated(
            x, w, window_strides=(2, 2), padding="VALID",
            dimension_numbers=("NCHW", "OIHW", "NCHW"),
            precision=lax.Precision.HIGHEST)
        x = x + b[None, :, None, None]
        x = jax.nn.elu(x)
    return x.reshape(x.shape[0], -1)


if __name__ == "__main__":
    key = jax.random.PRNGKey(0)
    k_obs, k_par = jax.random.split(key)

    batch, channels, conv_hidden = 2, 3, 16  # module requires 64x64 spatial
    obs = jax.random.normal(k_obs, (batch, channels, 64, 64), jnp.float32)
    params = init_vis_encoder_params(k_par, channels, conv_hidden=conv_hidden)

    # The kernel uses bf16 MXU operands; round inputs/weights to bf16 once so the f32
    # reference sees identical values and the comparison isolates kernel error.
    obs = obs.astype(jnp.bfloat16).astype(jnp.float32)
    params = [(w.astype(jnp.bfloat16).astype(jnp.float32), b.astype(jnp.float32))
              for w, b in params]

    out = jax.block_until_ready(jax.jit(vis_encoder_forward)(params, obs))

    expected_dim = 32 * conv_hidden
    assert out.shape == (batch, expected_dim), out.shape

    ref = jax.block_until_ready(vis_encoder_ref(params, obs))
    if not jnp.allclose(out, ref, atol=2e-2, rtol=2e-2):
        err = float(jnp.max(jnp.abs(out - ref)))
        raise AssertionError(f"Pallas VisEncoder output mismatch vs JAX reference (max abs err {err})")

    print("KERNEL_OK")
</pallas_src>

<mosaic_0001>
module attributes {stable_mosaic.version = 11 : i64} {
  func.func @_conv_mm_elu_kernel(%arg0: i32, %arg1: memref<512x128xbf16, #tpu.memory_space<vmem>>, %arg2: memref<128x16xbf16, #tpu.memory_space<vmem>>, %arg3: memref<1x16xf32, #tpu.memory_space<vmem>>, %arg4: memref<512x16xbf16, #tpu.memory_space<vmem>>) attributes {dimension_semantics = [#tpu.dimension_semantics<parallel>], iteration_bounds = array<i64: 4>, scalar_prefetch = 0 : i64, scratch_operands = 0 : i64, tpu.core_type = #tpu.core_type<tc>, window_params = [{transform_indices = @transform_0, window_bounds = array<i64: 512, 128>}, {pipeline_mode = #tpu.pipeline_mode<synchronous>, transform_indices = @transform_1, window_bounds = array<i64: 128, 16>}, {pipeline_mode = #tpu.pipeline_mode<synchronous>, transform_indices = @transform_2, window_bounds = array<i64: 1, 16>}, {transform_indices = @transform_3, window_bounds = array<i64: 512, 16>}]} {
    %c0 = arith.constant 0 : index
    %c0_0 = arith.constant 0 : index
    %0 = vector.load %arg1[%c0, %c0_0] : memref<512x128xbf16, #tpu.memory_space<vmem>>, vector<512x128xbf16>
    %c0_1 = arith.constant 0 : index
    %c0_2 = arith.constant 0 : index
    %1 = vector.load %arg2[%c0_1, %c0_2] : memref<128x16xbf16, #tpu.memory_space<vmem>>, vector<128x16xbf16>
    %cst = arith.constant dense<0.000000e+00> : vector<512x16xf32>
    %2 = tpu.matmul %0, %1, %cst {dimension_numbers = #tpu.dot_dimension_numbers<[1], [0], [0], [1], [0, 0, 1, 1], [], []>} : vector<512x128xbf16>, vector<128x16xbf16>, vector<512x16xf32> -> vector<512x16xf32>
    %c0_3 = arith.constant 0 : index
    %c0_4 = arith.constant 0 : index
    %3 = vector.load %arg3[%c0_3, %c0_4] : memref<1x16xf32, #tpu.memory_space<vmem>>, vector<1x16xf32>
    %4 = vector.broadcast %3 : vector<1x16xf32> to vector<512x16xf32>
    %5 = arith.addf %2, %4 : vector<512x16xf32>
    %cst_5 = arith.constant 0.000000e+00 : f32
    %6 = vector.broadcast %cst_5 : f32 to vector<512x16xf32>
    %7 = arith.minimumf %5, %6 : vector<512x16xf32>
    %8 = math.exp %7 : vector<512x16xf32>
    %cst_6 = arith.constant 1.000000e+00 : f32
    %9 = vector.broadcast %cst_6 : f32 to vector<512x16xf32>
    %10 = arith.subf %8, %9 : vector<512x16xf32>
    %cst_7 = arith.constant 0.000000e+00 : f32
    %11 = vector.broadcast %cst_7 : f32 to vector<512x16xf32>
    %12 = arith.cmpf ogt, %5, %11 : vector<512x16xf32>
    %13 = arith.select %12, %5, %10 : vector<512x16xi1>, vector<512x16xf32>
    %14 = arith.truncf %13 : vector<512x16xf32> to vector<512x16xbf16>
    %c0_8 = arith.constant 0 : index
    %c0_9 = arith.constant 0 : index
    %15 = vector.load %arg4[%c0_8, %c0_9] : memref<512x16xbf16, #tpu.memory_space<vmem>>, vector<512x16xbf16>
    tpu.vector_store %arg4[%c0_8, %c0_9], %14 {strides = array<i32>} : memref<512x16xbf16, #tpu.memory_space<vmem>>, vector<512x16xbf16>,
    return
  }
  func.func @transform_0(%arg0: i32) -> (i32, i32) {
    %c0_i32 = arith.constant 0 : i32
    %c0_i32_0 = arith.constant 0 : i32
    return %arg0, %c0_i32 : i32, i32
  }
  func.func @transform_1(%arg0: i32) -> (i32, i32) {
    %c0_i32 = arith.constant 0 : i32
    %c0_i32_0 = arith.constant 0 : i32
    %c0_i32_1 = arith.constant 0 : i32
    return %c0_i32, %c0_i32_0 : i32, i32
  }
  func.func @transform_2(%arg0: i32) -> (i32, i32) {
    %c0_i32 = arith.constant 0 : i32
    %c0_i32_0 = arith.constant 0 : i32
    %c0_i32_1 = arith.constant 0 : i32
    return %c0_i32, %c0_i32_0 : i32, i32
  }
  func.func @transform_3(%arg0: i32) -> (i32, i32) {
    %c0_i32 = arith.constant 0 : i32
    %c0_i32_0 = arith.constant 0 : i32
    return %arg0, %c0_i32 : i32, i32
  }
}

module attributes {stable_mosaic.version = 11 : i64} {
  func.func @_conv_mm_elu_kernel(%arg0: i32, %arg1: memref<208x256xbf16, #tpu.memory_space<vmem>>, %arg2: memref<256x32xbf16, #tpu.memory_space<vmem>>, %arg3: memref<1x32xf32, #tpu.memory_space<vmem>>, %arg4: memref<208x32xbf16, #tpu.memory_space<vmem>>) attributes {dimension_semantics = [#tpu.dimension_semantics<parallel>], iteration_bounds = array<i64: 2>, scalar_prefetch = 0 : i64, scratch_operands = 0 : i64, tpu.core_type = #tpu.core_type<tc>, window_params = [{transform_indices = @transform_0, window_bounds = array<i64: 208, 256>}, {pipeline_mode = #tpu.pipeline_mode<synchronous>, transform_indices = @transform_1, window_bounds = array<i64: 256, 32>}, {pipeline_mode = #tpu.pipeline_mode<synchronous>, transform_indices = @transform_2, window_bounds = array<i64: 1, 32>}, {transform_indices = @transform_3, window_bounds = array<i64: 208, 32>}]} {
    %c0 = arith.constant 0 : index
    %c0_0 = arith.constant 0 : index
    %0 = vector.load %arg1[%c0, %c0_0] : memref<208x256xbf16, #tpu.memory_space<vmem>>, vector<208x256xbf16>
    %c0_1 = arith.constant 0 : index
    %c0_2 = arith.constant 0 : index
    %1 = vector.load %arg2[%c0_1, %c0_2] : memref<256x32xbf16, #tpu.memory_space<vmem>>, vector<256x32xbf16>
    %cst = arith.constant dense<0.000000e+00> : vector<208x32xf32>
    %2 = tpu.matmul %0, %1, %cst {dimension_numbers = #tpu.dot_dimension_numbers<[1], [0], [0], [1], [0, 0, 1, 1], [], []>} : vector<208x256xbf16>, vector<256x32xbf16>, vector<208x32xf32> -> vector<208x32xf32>
    %c0_3 = arith.constant 0 : index
    %c0_4 = arith.constant 0 : index
    %3 = vector.load %arg3[%c0_3, %c0_4] : memref<1x32xf32, #tpu.memory_space<vmem>>, vector<1x32xf32>
    %4 = vector.broadcast %3 : vector<1x32xf32> to vector<208x32xf32>
    %5 = arith.addf %2, %4 : vector<208x32xf32>
    %cst_5 = arith.constant 0.000000e+00 : f32
    %6 = vector.broadcast %cst_5 : f32 to vector<208x32xf32>
    %7 = arith.minimumf %5, %6 : vector<208x32xf32>
    %8 = math.exp %7 : vector<208x32xf32>
    %cst_6 = arith.constant 1.000000e+00 : f32
    %9 = vector.broadcast %cst_6 : f32 to vector<208x32xf32>
    %10 = arith.subf %8, %9 : vector<208x32xf32>
    %cst_7 = arith.constant 0.000000e+00 : f32
    %11 = vector.broadcast %cst_7 : f32 to vector<208x32xf32>
    %12 = arith.cmpf ogt, %5, %11 : vector<208x32xf32>
    %13 = arith.select %12, %5, %10 : vector<208x32xi1>, vector<208x32xf32>
    %14 = arith.truncf %13 : vector<208x32xf32> to vector<208x32xbf16>
    %c0_8 = arith.constant 0 : index
    %c0_9 = arith.constant 0 : index
    %15 = vector.load %arg4[%c0_8, %c0_9] : memref<208x32xbf16, #tpu.memory_space<vmem>>, vector<208x32xbf16>
    tpu.vector_store %arg4[%c0_8, %c0_9], %14 {strides = array<i32>} : memref<208x32xbf16, #tpu.memory_space<vmem>>, vector<208x32xbf16>,
    return
  }
  func.func @transform_0(%arg0: i32) -> (i32, i32) {
    %c0_i32 = arith.constant 0 : i32
    %c0_i32_0 = arith.constant 0 : i32
    return %arg0, %c0_i32 : i32, i32
  }
  func.func @transform_1(%arg0: i32) -> (i32, i32) {
    %c0_i32 = arith.constant 0 : i32
    %c0_i32_0 = arith.constant 0 : i32
    %c0_i32_1 = arith.constant 0 : i32
    return %c0_i32, %c0_i32_0 : i32, i32
  }
  func.func @transform_2(%arg0: i32) -> (i32, i32) {
    %c0_i32 = arith.constant 0 : i32
    %c0_i32_0 = arith.constant 0 : i32
    %c0_i32_1 = arith.constant 0 : i32
    return %c0_i32, %c0_i32_0 : i32, i32
  }
  func.func @transform_3(%arg0: i32) -> (i32, i32) {
    %c0_i32 = arith.constant 0 : i32
    %c0_i32_0 = arith.constant 0 : i32
    return %arg0, %c0_i32 : i32, i32
  }
}

module attributes {stable_mosaic.version = 11 : i64} {
  func.func @_conv_mm_elu_kernel(%arg0: i32, %arg1: memref<48x512xbf16, #tpu.memory_space<vmem>>, %arg2: memref<512x64xbf16, #tpu.memory_space<vmem>>, %arg3: memref<1x64xf32, #tpu.memory_space<vmem>>, %arg4: memref<48x64xbf16, #tpu.memory_space<vmem>>) attributes {dimension_semantics = [#tpu.dimension_semantics<parallel>], iteration_bounds = array<i64: 2>, scalar_prefetch = 0 : i64, scratch_operands = 0 : i64, tpu.core_type = #tpu.core_type<tc>, window_params = [{transform_indices = @transform_0, window_bounds = array<i64: 48, 512>}, {pipeline_mode = #tpu.pipeline_mode<synchronous>, transform_indices = @transform_1, window_bounds = array<i64: 512, 64>}, {pipeline_mode = #tpu.pipeline_mode<synchronous>, transform_indices = @transform_2, window_bounds = array<i64: 1, 64>}, {transform_indices = @transform_3, window_bounds = array<i64: 48, 64>}]} {
    %c0 = arith.constant 0 : index
    %c0_0 = arith.constant 0 : index
    %0 = vector.load %arg1[%c0, %c0_0] : memref<48x512xbf16, #tpu.memory_space<vmem>>, vector<48x512xbf16>
    %c0_1 = arith.constant 0 : index
    %c0_2 = arith.constant 0 : index
    %1 = vector.load %arg2[%c0_1, %c0_2] : memref<512x64xbf16, #tpu.memory_space<vmem>>, vector<512x64xbf16>
    %cst = arith.constant dense<0.000000e+00> : vector<48x64xf32>
    %2 = tpu.matmul %0, %1, %cst {dimension_numbers = #tpu.dot_dimension_numbers<[1], [0], [0], [1], [0, 0, 1, 1], [], []>} : vector<48x512xbf16>, vector<512x64xbf16>, vector<48x64xf32> -> vector<48x64xf32>
    %c0_3 = arith.constant 0 : index
    %c0_4 = arith.constant 0 : index
    %3 = vector.load %arg3[%c0_3, %c0_4] : memref<1x64xf32, #tpu.memory_space<vmem>>, vector<1x64xf32>
    %4 = vector.broadcast %3 : vector<1x64xf32> to vector<48x64xf32>
    %5 = arith.addf %2, %4 : vector<48x64xf32>
    %cst_5 = arith.constant 0.000000e+00 : f32
    %6 = vector.broadcast %cst_5 : f32 to vector<48x64xf32>
    %7 = arith.minimumf %5, %6 : vector<48x64xf32>
    %8 = math.exp %7 : vector<48x64xf32>
    %cst_6 = arith.constant 1.000000e+00 : f32
    %9 = vector.broadcast %cst_6 : f32 to vector<48x64xf32>
    %10 = arith.subf %8, %9 : vector<48x64xf32>
    %cst_7 = arith.constant 0.000000e+00 : f32
    %11 = vector.broadcast %cst_7 : f32 to vector<48x64xf32>
    %12 = arith.cmpf ogt, %5, %11 : vector<48x64xf32>
    %13 = arith.select %12, %5, %10 : vector<48x64xi1>, vector<48x64xf32>
    %14 = arith.truncf %13 : vector<48x64xf32> to vector<48x64xbf16>
    %c0_8 = arith.constant 0 : index
    %c0_9 = arith.constant 0 : index
    %15 = vector.load %arg4[%c0_8, %c0_9] : memref<48x64xbf16, #tpu.memory_space<vmem>>, vector<48x64xbf16>
    tpu.vector_store %arg4[%c0_8, %c0_9], %14 {strides = array<i32>} : memref<48x64xbf16, #tpu.memory_space<vmem>>, vector<48x64xbf16>,
    return
  }
  func.func @transform_0(%arg0: i32) -> (i32, i32) {
    %c0_i32 = arith.constant 0 : i32
    %c0_i32_0 = arith.constant 0 : i32
    return %arg0, %c0_i32 : i32, i32
  }
  func.func @transform_1(%arg0: i32) -> (i32, i32) {
    %c0_i32 = arith.constant 0 : i32
    %c0_i32_0 = arith.constant 0 : i32
    %c0_i32_1 = arith.constant 0 : i32
    return %c0_i32, %c0_i32_0 : i32, i32
  }
  func.func @transform_2(%arg0: i32) -> (i32, i32) {
    %c0_i32 = arith.constant 0 : i32
    %c0_i32_0 = arith.constant 0 : i32
    %c0_i32_1 = arith.constant 0 : i32
    return %c0_i32, %c0_i32_0 : i32, i32
  }
  func.func @transform_3(%arg0: i32) -> (i32, i32) {
    %c0_i32 = arith.constant 0 : i32
    %c0_i32_0 = arith.constant 0 : i32
    return %arg0, %c0_i32 : i32, i32
  }
}

module attributes {stable_mosaic.version = 11 : i64} {
  func.func @_conv_mm_elu_kernel(%arg0: i32, %arg1: memref<16x1024xbf16, #tpu.memory_space<vmem>>, %arg2: memref<1024x128xbf16, #tpu.memory_space<vmem>>, %arg3: memref<1x128xf32, #tpu.memory_space<vmem>>, %arg4: memref<16x128xf32, #tpu.memory_space<vmem>>) attributes {dimension_semantics = [#tpu.dimension_semantics<parallel>], iteration_bounds = array<i64: 1>, scalar_prefetch = 0 : i64, scratch_operands = 0 : i64, tpu.core_type = #tpu.core_type<tc>, window_params = [{transform_indices = @transform_0, window_bounds = array<i64: 16, 1024>}, {pipeline_mode = #tpu.pipeline_mode<synchronous>, transform_indices = @transform_1, window_bounds = array<i64: 1024, 128>}, {pipeline_mode = #tpu.pipeline_mode<synchronous>, transform_indices = @transform_2, window_bounds = array<i64: 1, 128>}, {transform_indices = @transform_3, window_bounds = array<i64: 16, 128>}]} {
    %c0 = arith.constant 0 : index
    %c0_0 = arith.constant 0 : index
    %0 = vector.load %arg1[%c0, %c0_0] : memref<16x1024xbf16, #tpu.memory_space<vmem>>, vector<16x1024xbf16>
    %c0_1 = arith.constant 0 : index
    %c0_2 = arith.constant 0 : index
    %1 = vector.load %arg2[%c0_1, %c0_2] : memref<1024x128xbf16, #tpu.memory_space<vmem>>, vector<1024x128xbf16>
    %cst = arith.constant dense<0.000000e+00> : vector<16x128xf32>
    %2 = tpu.matmul %0, %1, %cst {dimension_numbers = #tpu.dot_dimension_numbers<[1], [0], [0], [1], [0, 0, 1, 1], [], []>} : vector<16x1024xbf16>, vector<1024x128xbf16>, vector<16x128xf32> -> vector<16x128xf32>
    %c0_3 = arith.constant 0 : index
    %c0_4 = arith.constant 0 : index
    %3 = vector.load %arg3[%c0_3, %c0_4] : memref<1x128xf32, #tpu.memory_space<vmem>>, vector<1x128xf32>
    %4 = vector.broadcast %3 : vector<1x128xf32> to vector<16x128xf32>
    %5 = arith.addf %2, %4 : vector<16x128xf32>
    %cst_5 = arith.constant 0.000000e+00 : f32
    %6 = vector.broadcast %cst_5 : f32 to vector<16x128xf32>
    %7 = arith.minimumf %5, %6 : vector<16x128xf32>
    %8 = math.exp %7 : vector<16x128xf32>
    %cst_6 = arith.constant 1.000000e+00 : f32
    %9 = vector.broadcast %cst_6 : f32 to vector<16x128xf32>
    %10 = arith.subf %8, %9 : vector<16x128xf32>
    %cst_7 = arith.constant 0.000000e+00 : f32
    %11 = vector.broadcast %cst_7 : f32 to vector<16x128xf32>
    %12 = arith.cmpf ogt, %5, %11 : vector<16x128xf32>
    %13 = arith.select %12, %5, %10 : vector<16x128xi1>, vector<16x128xf32>
    %c0_8 = arith.constant 0 : index
    %c0_9 = arith.constant 0 : index
    %14 = vector.load %arg4[%c0_8, %c0_9] : memref<16x128xf32, #tpu.memory_space<vmem>>, vector<16x128xf32>
    tpu.vector_store %arg4[%c0_8, %c0_9], %13 {strides = array<i32>} : memref<16x128xf32, #tpu.memory_space<vmem>>, vector<16x128xf32>,
    return
  }
  func.func @transform_0(%arg0: i32) -> (i32, i32) {
    %c0_i32 = arith.constant 0 : i32
    %c0_i32_0 = arith.constant 0 : i32
    return %arg0, %c0_i32 : i32, i32
  }
  func.func @transform_1(%arg0: i32) -> (i32, i32) {
    %c0_i32 = arith.constant 0 : i32
    %c0_i32_0 = arith.constant 0 : i32
    %c0_i32_1 = arith.constant 0 : i32
    return %c0_i32, %c0_i32_0 : i32, i32
  }
  func.func @transform_2(%arg0: i32) -> (i32, i32) {
    %c0_i32 = arith.constant 0 : i32
    %c0_i32_0 = arith.constant 0 : i32
    %c0_i32_1 = arith.constant 0 : i32
    return %c0_i32, %c0_i32_0 : i32, i32
  }
  func.func @transform_3(%arg0: i32) -> (i32, i32) {
    %c0_i32 = arith.constant 0 : i32
    %c0_i32_0 = arith.constant 0 : i32
    return %arg0, %c0_i32 : i32, i32
  }
}

</mosaic_0001>

<bundles_post_ra>
// kernel: vis_encoder_forward.4
= control target key start
LH: loop header
LB: loop body
LE: loop exit
PB: predicated region body
PF: predicated region fallthrough
CT: control target
= control target key end

     0   :  { %s2137_s12 = smov 0   ;;  %s2831_s0 = inlined_call_operand.vmem [shape: bf16[2048,128], index: 0, kind: input, shape index: {}]   ;;  %s2832_s1 = inlined_call_operand.vmem [shape: bf16[128,16], index: 1, kind: input, shape index: {}]   ;;  %s2833_s2 = inlined_call_operand.vmem [shape: f32[1,16], index: 2, kind: input, shape index: {}]   ;;  %s2834_s3 = inlined_call_operand.vmem [shape: bf16[2048,16], index: 3, kind: output, shape index: {}]  }
   0x1 LB: > { %s1552_s13 = sadd.s32 4294967295, %s2115_s12   ;;  %p1556_p0 = scmp.ge.s32.totalorder %s2115_s12, 1  ;;  %s2115_s12 = sphi %s2137_s12, %s13_s12  }
   0x2   : > { %p138_p1 = scmp.lt.s32.totalorder %s2115_s12, 5 }
   0x4   : > { %p139_p2 = pnand %p1556_p0, %p138_p1 }
   0x5   : > { %s1557_s16 = sshll.u32 (!%p139_p2), %s1552_s13, 6 }
   0x6   : > { %142 = sbr.rel (%p139_p2) target bundleno = 380 (0x17c), region = 32  ;;  %p163_p3 = scmp.lt.s32.totalorder (!%p139_p2), %s1557_s16, 255 }
   0xb   : > { %v1940_v0 = vld [vmem:[%s2832_s1 + $0x38] sm:$0xff]   ;;  %v1941_v1 = vld [vmem:[%s2832_s1 + $0x30] sm:$0xff]   ;;  %s2836_s16 = smov (!%p163_p3, %s1557_s16), 255  ;;  %v1942_v2 = vld [vmem:[%s2832_s1 + $0x28] sm:$0xff]   ;;  %vm1431_vm0 = vcmask 125952  }
   0xc   : > { %1836 = vmatprep.subr.bf16.mxu0 %v1940_v0  ;;  %1916 = vmatprep.subr.bf16.mxu1 %v1940_v0  ;;  %s1558_s21 = sshll.u32 %s2836_s16, 2  ;;  %v1943_v3 = vld [vmem:[%s2832_s1 + $0x20] sm:$0xff]   ;;  %v1944_v6 = vld [vmem:[%s2832_s1 + $0x18] sm:$0xff]   ;;  %v1945_v7 = vld [vmem:[%s2832_s1 + $0x10] sm:$0xff]  }
   0xd   : > { %1837 = vmatpush3.bf16.msra.mxu0 %v1940_v0  ;;  %1924 = vmatpush3.bf16.msra.mxu1 %v1940_v0  ;;  %s2162_s24 = scalar_lea.vmem %s2831_s0, %s1558_s21  ;;  %v1946_v8 = vld [vmem:[%s2832_s1 + $0x8] sm:$0xff]   ;;  %v1947_v9 = vld [vmem:[%s2832_s1] sm:$0xff]   ;;  %s2298_s13 = scalar_lea.vmem %s2834_s3, %s1558_s21 }
   0xe   : > { %1838 = vmatprep.subr.bf16.mxu0 %v1941_v1  ;;  %1917 = vmatprep.subr.bf16.mxu1 %v1941_v1  ;;  %v1948_v4 = vld [vmem:[%s2162_s24] sm:$0xff]   ;;  %v1950_v10 = vld [vmem:[%s2162_s24 + $0x8] sm:$0xff]   ;;  %v1952_v12 = vld [vmem:[%s2162_s24 + $0x10] sm:$0xff]  }
   0xf   : > { %v1949_v5 = vld [vmem:[%s2162_s24 + $0x80] sm:$0xff]   ;;  %1852 = vmatprep.mubr.bf16.mxu0 %v1948_v4  ;;  %v1951_v11 = vld [vmem:[%s2162_s24 + $0x88] sm:$0xff]   ;;  %v1953_v13 = vld [vmem:[%s2162_s24 + $0x90] sm:$0xff]  }
  0x10   : > { %1884 = vmatprep.mubr.bf16.mxu1 %v1949_v5  ;;  %v1954_v14 = vld [vmem:[%s2162_s24 + $0x18] sm:$0xff]   ;;  %v1956_v16 = vld [vmem:[%s2162_s24 + $0x20] sm:$0xff]   ;;  %v1958_v18 = vld [vmem:[%s2162_s24 + $0x28] sm:$0xff]  }
  0x11   : > { %1839 = vmatpush3.bf16.msra.mxu0 %v1941_v1  ;;  %1925 = vmatpush3.bf16.msra.mxu1 %v1941_v1  ;;  %v1955_v15 = vld [vmem:[%s2162_s24 + $0x98] sm:$0xff]   ;;  %v1957_v17 = vld [vmem:[%s2162_s24 + $0xa0] sm:$0xff]   ;;  %v1959_v19 = vld [vmem:[%s2162_s24 + $0xa8] sm:$0xff]  }
  0x12   : > { %1840 = vmatprep.subr.bf16.mxu0 %v1942_v2  ;;  %1918 = vmatprep.subr.bf16.mxu1 %v1942_v2  ;;  %v1960_v20 = vld [vmem:[%s2162_s24 + $0x30] sm:$0xff]   ;;  %v1962_v22 = vld [vmem:[%s2162_s24 + $0x38] sm:$0xff]   ;;  %v1964_v24 = vld [vmem:[%s2162_s24 + $0x40] sm:$0xff]  }
  0x13   : > { %v1961_v21 = vld [vmem:[%s2162_s24 + $0xb0] sm:$0xff]   ;;  %v1963_v23 = vld [vmem:[%s2162_s24 + $0xb8] sm:$0xff]   ;;  %v1965_v25 = vld [vmem:[%s2162_s24 + $0xc0] sm:$0xff]  }
  0x14   : > { %v1966_v26 = vld [vmem:[%s2162_s24 + $0x48] sm:$0xff]   ;;  %v1968_v28 = vld [vmem:[%s2162_s24 + $0x50] sm:$0xff]   ;;  %v1970_v30 = vld [vmem:[%s2162_s24 + $0x58] sm:$0xff]  }
  0x15   : > { %1841 = vmatpush3.bf16.msra.mxu0 %v1942_v2  ;;  %1926 = vmatpush3.bf16.msra.mxu1 %v1942_v2  ;;  %v1967_v27 = vld [vmem:[%s2162_s24 + $0xc8] sm:$0xff]   ;;  %v1969_v29 = vld [vmem:[%s2162_s24 + $0xd0] sm:$0xff]   ;;  %v1971_v31 = vld [vmem:[%s2162_s24 + $0xd8] sm:$0xff]  }
  0x16   : > { %1842 = vmatprep.subr.bf16.mxu0 %v1943_v3  ;;  %1919 = vmatprep.subr.bf16.mxu1 %v1943_v3  ;;  %v1972_v32 = vld [vmem:[%s2162_s24 + $0x60] sm:$0xff]   ;;  %v1974_v34 = vld [vmem:[%s2162_s24 + $0x68] sm:$0xff]   ;;  %v1976_v36 = vld [vmem:[%s2162_s24 + $0x70] sm:$0xff]  }
  0x17   : > { %v1973_v33 = vld [vmem:[%s2162_s24 + $0xe0] sm:$0xff]   ;;  %v1975_v35 = vld [vmem:[%s2162_s24 + $0xe8] sm:$0xff]   ;;  %v1977_v37 = vld [vmem:[%s2162_s24 + $0xf0] sm:$0xff]  }
  0x18   : > { %v1978_v38 = vld [vmem:[%s2162_s24 + $0x78] sm:$0xff]   ;;  %v2214_v40 = vld [vmem:[%s2833_s2] ss:$0 sm:$0xff] }
  0x19   : > { %1843 = vmatpush3.bf16.msra.mxu0 %v1943_v3  ;;  %1927 = vmatpush3.bf16.msra.mxu1 %v1943_v3  ;;  %v1979_v39 = vld [vmem:[%s2162_s24 + $0xf8] sm:$0xff]  }
  0x1a   : > { %1844 = vmatprep.subr.bf16.mxu0 %v1944_v6  ;;  %1920 = vmatprep.subr.bf16.mxu1 %v1944_v6 }
  0x1d   : > { %1845 = vmatpush3.bf16.msra.mxu0 %v1944_v6  ;;  %1928 = vmatpush3.bf16.msra.mxu1 %v1944_v6 }
  0x1e   : > { %1846 = vmatprep.subr.bf16.mxu0 %v1945_v7  ;;  %1921 = vmatprep.subr.bf16.mxu1 %v1945_v7 }
  0x21   : > { %1847 = vmatpush3.bf16.msra.mxu0 %v1945_v7  ;;  %1929 = vmatpush3.bf16.msra.mxu1 %v1945_v7 }
  0x22   : > { %1848 = vmatprep.subr.bf16.mxu0 %v1946_v8  ;;  %1922 = vmatprep.subr.bf16.mxu1 %v1946_v8 }
  0x25   : > { %1849 = vmatpush3.bf16.msra.mxu0 %v1946_v8  ;;  %1930 = vmatpush3.bf16.msra.mxu1 %v1946_v8 }
  0x26   : > { %1850 = vmatprep.subr.bf16.mxu0 %v1947_v9  ;;  %1923 = vmatprep.subr.bf16.mxu1 %v1947_v9 }
  0x29   : > { %1851 = vmatpush3.bf16.msra.mxu0 %v1947_v9  ;;  %1931 = vmatpush3.bf16.msra.mxu1 %v1947_v9 }
  0x2c   : > { %1853 = vmatmul.mubr.bf16.vlgmr.msra.gmra.mxu0 %v1950_v10  ;;  %1885 = vmatmul.mubr.bf16.vlgmr.msra.gmra.mxu1 %v1951_v11 }
  0x2d   : > { %1856 = vmatprep.mubr.bf16.mxu0 %v1952_v12  ;;  %1888 = vmatprep.mubr.bf16.mxu1 %v1953_v13 }
  0x34   : > { %1857 = vmatmul.mubr.bf16.gmra.mxu0 %v1954_v14  ;;  %1889 = vmatmul.mubr.bf16.gmra.mxu1 %v1955_v15 }
  0x35   : > { %1860 = vmatprep.mubr.bf16.mxu0 %v1956_v16  ;;  %1892 = vmatprep.mubr.bf16.mxu1 %v1957_v17 }
  0x3c   : > { %1861 = vmatmul.mubr.bf16.gmra.mxu0 %v1958_v18  ;;  %1893 = vmatmul.mubr.bf16.gmra.mxu1 %v1959_v19 }
  0x3d   : > { %1864 = vmatprep.mubr.bf16.mxu0 %v1960_v20  ;;  %1896 = vmatprep.mubr.bf16.mxu1 %v1961_v21 }
  0x44   : > { %1865 = vmatmul.mubr.bf16.gmra.mxu0 %v1962_v22  ;;  %1897 = vmatmul.mubr.bf16.gmra.mxu1 %v1963_v23 }
  0x45   : > { %1868 = vmatprep.mubr.bf16.mxu0 %v1964_v24  ;;  %1900 = vmatprep.mubr.bf16.mxu1 %v1965_v25 }
  0x4c   : > { %1869 = vmatmul.mubr.bf16.gmra.mxu0 %v1966_v26  ;;  %1901 = vmatmul.mubr.bf16.gmra.mxu1 %v1967_v27 }
  0x4d   : > { %1872 = vmatprep.mubr.bf16.mxu0 %v1968_v28  ;;  %1904 = vmatprep.mubr.bf16.mxu1 %v1969_v29 }
  0x54   : > { %1873 = vmatmul.mubr.bf16.gmra.mxu0 %v1970_v30  ;;  %1905 = vmatmul.mubr.bf16.gmra.mxu1 %v1971_v31 }
  0x55   : > { %1876 = vmatprep.mubr.bf16.mxu0 %v1972_v32  ;;  %1908 = vmatprep.mubr.bf16.mxu1 %v1973_v33 }
  0x5c   : > { %1877 = vmatmul.mubr.bf16.gmra.mxu0 %v1974_v34  ;;  %1909 = vmatmul.mubr.bf16.gmra.mxu1 %v1975_v35 }
  0x5d   : > { %1880 = vmatprep.mubr.bf16.mxu0 %v1976_v36  ;;  %1912 = vmatprep.mubr.bf16.mxu1 %v1977_v37 }
  0x64   : > { %1881 = vmatmul.mubr.bf16.gmra.mxu0 %v1978_v38  ;;  %1913 = vmatmul.mubr.bf16.gmra.mxu1 %v1979_v39 }
  0xec   : > { %v1854_v41 = vpop.f32.mrf.mxu0  ;;  %v1886_v42 = vpop.f32.mrf.mxu1 }
  0xed   : > { %v2217_v43 = vadd.f32 %v1854_v41, %v2214_v40  ;;  %v2220_v44 = vadd.f32 %v1886_v42, %v2214_v40 }
  0xee   : > { %v536_v45 = vpop.f32.mrf.mxu0  ;;  %v664_v46 = vpop.f32.mrf.mxu1 }
  0xef   : > { %v793_v47 = vmin.f32 %v2217_v43, 0.0  ;;  %v825_v48 = vmin.f32 %v2220_v44, 0.0  ;;  %v2225_v49 = vadd.f32 %v2214_v40, %v536_v45  ;;  %v2228_v50 = vadd.f32 %v2214_v40, %v664_v46 }
  0xf0   : > { %v1855_v51 = vpop.f32.mrf.mxu0  ;;  %v1887_v52 = vpop.f32.mrf.mxu1  ;;  %vm1049_vm1 = vcmp.gt.f32.partialorder %v2217_v43, 0.0  ;;  %vm1081_vm2 = vcmp.gt.f32.partialorder %v2220_v44, 0.0 }
  0xf1   : > { %v859_v53 = vmul.f32 1.442695, %v793_v47  ;;  %v923_v54 = vmul.f32 1.442695, %v825_v48  ;;  %v2231_v55 = vadd.f32 %v1855_v51, %v2214_v40  ;;  %v2234_v56 = vadd.f32 %v1887_v52, %v2214_v40 }
  0xf2   : > { %v791_v57 = vmin.f32 %v2225_v49, 0.0  ;;  %v823_v58 = vmin.f32 %v2228_v50, 0.0  ;;  %v539_v59 = vpop.f32.mrf.mxu0  ;;  %v667_v60 = vpop.f32.mrf.mxu1  ;;  %vm1047_vm3 = vcmp.gt.f32.partialorder %v2225_v49, 0.0  ;;  %vm1079_vm4 = vcmp.gt.f32.partialorder %v2228_v50, 0.0 }
  0xf3   : > { %1980 = vpow2.f32 %v859_v53  ;;  %v794_v61 = vmin.f32 %v2231_v55, 0.0  ;;  %v826_v62 = vmin.f32 %v2234_v56, 0.0  ;;  %v2241_v5 = vadd.f32 %v2214_v40, %v539_v59 }
  0xf4   : > { %1982 = vpow2.f32 %v923_v54  ;;  %v855_v63 = vmul.f32 1.442695, %v791_v57  ;;  %v919_v0 = vmul.f32 1.442695, %v823_v58  ;;  %v1858_v1 = vpop.f32.mrf.mxu0  ;;  %v1890_v2 = vpop.f32.mrf.mxu1  ;;  %v2244_v6 = vadd.f32 %v2214_v40, %v667_v60 }
  0xf5   : > { %v861_v3 = vmul.f32 1.442695, %v794_v61  ;;  %v925_v4 = vmul.f32 1.442695, %v826_v62  ;;  %v2247_v7 = vadd.f32 %v1858_v1, %v2214_v40  ;;  %v2250_v8 = vadd.f32 %v1890_v2, %v2214_v40 }
  0xf6   : > { %1984 = vpow2.f32 %v855_v63  ;;  %v552_v9 = vpop.f32.mrf.mxu0  ;;  %v680_v10 = vpop.f32.mrf.mxu1  ;;  %v792_v11 = vmin.f32 %v2241_v5, 0.0  ;;  %v824_v12 = vmin.f32 %v2244_v6, 0.0  ;;  %vm1050_vm5 = vcmp.gt.f32.partialorder %v2231_v55, 0.0 }
  0xf7   : > { %1986 = vpow2.f32 %v919_v0  ;;  %v797_v13 = vmin.f32 %v2247_v7, 0.0  ;;  %v829_v18 = vmin.f32 %v2250_v8, 0.0  ;;  %v2257_v20 = vadd.f32 %v2214_v40, %v552_v9 }
  0xf8   : > { %1988 = vpow2.f32 %v861_v3  ;;  %v1859_v14 = vpop.f32.mrf.mxu0  ;;  %v1891_v15 = vpop.f32.mrf.mxu1  ;;  %v857_v16 = vmul.f32 1.442695, %v792_v11  ;;  %v921_v17 = vmul.f32 1.442695, %v824_v12  ;;  %v2260_v21 = vadd.f32 %v2214_v40, %v680_v10 }
  0xf9   : > { %1990 = vpow2.f32 %v925_v4  ;;  %v867_v19 = vmul.f32 1.442695, %v797_v13  ;;  %v931_v23 = vmul.f32 1.442695, %v829_v18  ;;  %v2263_v24 = vadd.f32 %v1859_v14, %v2214_v40 }
  0xfa   : > { %v555_v22 = vpop.f32.mrf.mxu0  ;;  %1992 = vpow2.f32 %v857_v16  ;;  %v2266_v25 = vadd.f32 %v1891_v15, %v2214_v40  ;;  %v683_v26 = vpop.f32.mrf.mxu1  ;;  %v795_v27 = vmin.f32 %v2257_v20, 0.0  ;;  %v827_v28 = vmin.f32 %v2260_v21, 0.0 }
  0xfb   : > { %1994 = vpow2.f32 %v921_v17  ;;  %v798_v29 = vmin.f32 %v2263_v24, 0.0  ;;  %v2277_v35 = vadd.f32 %v2214_v40, %v555_v22  ;;  %v2280_v36 = vadd.f32 %v2214_v40, %v683_v26 }
  0xfc   : > { %1996 = vpow2.f32 %v867_v19  ;;  %v1862_v30 = vpop.f32.mrf.mxu0  ;;  %v863_v31 = vmul.f32 1.442695, %v795_v27  ;;  %v927_v32 = vmul.f32 1.442695, %v827_v28  ;;  %v830_v33 = vmin.f32 %v2266_v25, 0.0  ;;  %v1894_v37 = vpop.f32.mrf.mxu1 }
  0xfd   : > { %1998 = vpow2.f32 %v931_v23  ;;  %v869_v34 = vmul.f32 1.442695, %v798_v29  ;;  %v2284_v41 = vadd.f32 %v1862_v30, %v2214_v40  ;;  %vm1082_vm6 = vcmp.gt.f32.partialorder %v2234_v56, 0.0 }
  0xfe   : > { %2000 = vpow2.f32 %v863_v31  ;;  %v933_v39 = vmul.f32 1.442695, %v830_v33  ;;  %v796_v46 = vmin.f32 %v2277_v35, 0.0  ;;  %vm1048_vm7 = vcmp.gt.f32.partialorder %v2241_v5, 0.0  ;;  %v568_v58 = vpop.f32.mrf.mxu0  ;;  %v696_v3 = vpop.f32.mrf.mxu1 }
  0xff   : > { %2002 = vpow2.f32 %v927_v32  ;;  %v828_v48 = vmin.f32 %v2280_v36, 0.0  ;;  %v2291_v51 = vadd.f32 %v1894_v37, %v2214_v40  ;;  %vm1080_vm8 = vcmp.gt.f32.partialorder %v2244_v6, 0.0 }
 0x100   : > { %v1981_v38 = vpop.eup %1980  ;;  %2004 = vpow2.f32 %v869_v34  ;;  %v865_v54 = vmul.f32 1.442695, %v796_v46  ;;  %v801_v57 = vmin.f32 %v2284_v41, 0.0  ;;  %vm1053_vm9 = vcmp.gt.f32.partialorder %v2247_v7, 0.0  ;;  %v1863_v13 = vpop.f32.mrf.mxu0 }
 0x101   : > { %v1983_v42 = vpop.eup %1982  ;;  %v1604_v45 = vadd.f32 -1.0, %v1981_v38  ;;  %2006 = vpow2.f32 %v933_v39  ;;  %v929_v63 = vmul.f32 1.442695, %v828_v48  ;;  %vm1085_vm10 = vcmp.gt.f32.partialorder %v2250_v8, 0.0 }
 0x102   : > { %v1636_v47 = vadd.f32 -1.0, %v1983_v42  ;;  %2008 = vpow2.f32 %v865_v54  ;;  %v875_v2 = vmul.f32 1.442695, %v801_v57  ;;  %vm1051_vm11 = vcmp.gt.f32.partialorder %v2257_v20, 0.0  ;;  %v571_v33 = vpop.f32.mrf.mxu0 }
 0x103   : > { %v1985_v52 = vpop.eup %1984  ;;  %v1113_v53 = vsel %vm1049_vm1, %v2217_v43, %v1604_v45  ;;  %2010 = vpow2.f32 %v929_v63  ;;  %vm1083_vm12 = vcmp.gt.f32.partialorder %v2260_v21, 0.0  ;;  %v833_v16 = vmin.f32 %v2291_v51, 0.0 }
 0x104   : > { %v1987_v59 = vpop.eup %1986  ;;  %v1734_v60 = vpack.c.bf16 %v1113_v53, %v1113_v53  ;;  %v1145_v61 = vsel %vm1081_vm2, %v2220_v44, %v1636_v47  ;;  %v1602_v62 = vadd.f32 -1.0, %v1985_v52  ;;  %2012 = vpow2.f32 %v875_v2 }
 0x105   : > { %v1989_v43 = vpop.eup %1988  ;;  %v1766_v0 = vpack.c.bf16 %v1145_v61, %v1145_v61  ;;  %v1634_v1 = vadd.f32 -1.0, %v1987_v59  ;;  %vm1054_vm13 = vcmp.gt.f32.partialorder %v2263_v24, 0.0  ;;  %v2333_v22 = vadd.f32 %v2214_v40, %v568_v58  ;;  %v1866_v59 = vpop.f32.mrf.mxu0 }
 0x106   : > { %v1991_v4 = vpop.eup %1990  ;;  %1434 = vst.msk [vmem:[%s2298_s13 + $0x8] sm:$0xf] %vm1431_vm0, %v1734_v60  ;;  %v1111_v9 = vsel %vm1047_vm3, %v2225_v49, %v1602_v62  ;;  %v1605_v10 = vadd.f32 -1.0, %v1989_v43  ;;  %v939_v28 = vmul.f32 1.442695, %v833_v16  ;;  %v2338_v29 = vadd.f32 %v2214_v40, %v696_v3 }
 0x107   : > { %1466 = vst.msk [vmem:[%s2298_s13 + $0x88] sm:$0xf] %vm1431_vm0, %v1766_v0  ;;  %v1732_v44 = vpack.c.bf16 %v1111_v9, %v1111_v9  ;;  %v1143_v11 = vsel %vm1079_vm4, %v2228_v50, %v1634_v1  ;;  %v1637_v12 = vadd.f32 -1.0, %v1991_v4  ;;  %v1993_v14 = vpop.eup %1992  ;;  %vm1086_vm14 = vcmp.gt.f32.partialorder %v2266_v25, 0.0 }
 0x108   : > { %v1764_v49 = vpack.c.bf16 %v1143_v11, %v1143_v11  ;;  %v1114_v15 = vsel %vm1050_vm5, %v2231_v55, %v1605_v10  ;;  %v1995_v17 = vpop.eup %1994  ;;  %v1603_v19 = vadd.f32 -1.0, %v1993_v14  ;;  %v1895_v55 = vpop.f32.mrf.mxu1  ;;  %v799_v32 = vmin.f32 %v2333_v22, 0.0 }
 0x109   : > { %1432 = vst.msk [vmem:[%s2298_s13] sm:$0xf] %vm1431_vm0, %v1732_v44  ;;  %v1735_v50 = vpack.c.bf16 %v1114_v15, %v1114_v15  ;;  %v1146_v18 = vsel %vm1082_vm6, %v2234_v56, %v1637_v12  ;;  %v1997_v23 = vpop.eup %1996  ;;  %v1635_v27 = vadd.f32 -1.0, %v1995_v17  ;;  %2014 = vpow2.f32 %v939_v28 }
 0x10a   : > { %1464 = vst.msk [vmem:[%s2298_s13 + $0x80] sm:$0xf] %vm1431_vm0, %v1764_v49  ;;  %v1767_v26 = vpack.c.bf16 %v1146_v18, %v1146_v18  ;;  %v1999_v30 = vpop.eup %1998  ;;  %v1112_v56 = vsel %vm1048_vm7, %v2241_v5, %v1603_v19  ;;  %v1608_v31 = vadd.f32 -1.0, %v1997_v23  ;;  %v871_v45 = vmul.f32 1.442695, %v799_v32  ;;  %v699_v47 = vpop.f32.mrf.mxu1 }
 0x10b   : > { %1435 = vst.msk [vmem:[%s2298_s13 + $0xc] sm:$0xf] %vm1431_vm0, %v1735_v50  ;;  %v1733_v34 = vpack.c.bf16 %v1112_v56, %v1112_v56  ;;  %v1144_v37 = vsel %vm1080_vm8, %v2244_v6, %v1635_v27  ;;  %v1640_v38 = vadd.f32 -1.0, %v1999_v30  ;;  %v2001_v39 = vpop.eup %2000  ;;  %v831_v46 = vmin.f32 %v2338_v29, 0.0 }
 0x10c   : > { %1467 = vst.msk [vmem:[%s2298_s13 + $0x8c] sm:$0xf] %vm1431_vm0, %v1767_v26  ;;  %v1765_v42 = vpack.c.bf16 %v1144_v37, %v1144_v37  ;;  %v1117_v5 = vsel %vm1053_vm9, %v2247_v7, %v1608_v31  ;;  %v2003_v48 = vpop.eup %2002  ;;  %v1606_v53 = vadd.f32 -1.0, %v2001_v39  ;;  %vm1052_vm15 = vcmp.gt.f32.partialorder %v2277_v35, 0.0  ;;  %v1898_v2 = vpop.f32.mrf.mxu1 }
 0x10d   : > { %1433 = vst.msk [vmem:[%s2298_s13 + $0x4] sm:$0xf] %vm1431_vm0, %v1733_v34  ;;  %v1738_v52 = vpack.c.bf16 %v1117_v5, %v1117_v5  ;;  %v1149_v6 = vsel %vm1085_vm10, %v2250_v8, %v1640_v38  ;;  %v2005_v54 = vpop.eup %2004  ;;  %v1638_v57 = vadd.f32 -1.0, %v2003_v48  ;;  %2016 = vpow2.f32 %v871_v45 }
 0x10e   : > { %1465 = vst.msk [vmem:[%s2298_s13 + $0x84] sm:$0xf] %vm1431_vm0, %v1765_v42  ;;  %v1770_v7 = vpack.c.bf16 %v1149_v6, %v1149_v6  ;;  %v935_v58 = vmul.f32 1.442695, %v831_v46  ;;  %v2007_v60 = vpop.eup %2006  ;;  %v1115_v61 = vsel %vm1051_vm11, %v2257_v20, %v1606_v53  ;;  %v1609_v8 = vadd.f32 -1.0, %v2005_v54  ;;  %v712_v18 = vpop.f32.mrf.mxu1 }
 0x10f   : > { %1438 = vst.msk [vmem:[%s2298_s13 + $0x18] sm:$0xf] %vm1431_vm0, %v1738_v52  ;;  %v2370_v62 = vadd.f32 %v1863_v13, %v2214_v40  ;;  %v2373_v63 = vadd.f32 %v1895_v55, %v2214_v40  ;;  %v1736_v43 = vpack.c.bf16 %v1115_v61, %v1115_v61  ;;  %v1147_v0 = vsel %vm1083_vm12, %v2260_v21, %v1638_v57  ;;  %v2009_v20 = vpop.eup %2008  ;;  %v584_v13 = vpop.f32.mrf.mxu0 }
 0x110   : > { %1470 = vst.msk [vmem:[%s2298_s13 + $0x98] sm:$0xf] %vm1431_vm0, %v1770_v7  ;;  %v1641_v1 = vadd.f32 -1.0, %v2007_v60  ;;  %2018 = vpow2.f32 %v935_v58  ;;  %v1768_v3 = vpack.c.bf16 %v1147_v0, %v1147_v0  ;;  %v1118_v4 = vsel %vm1054_vm13, %v2263_v24, %v1609_v8  ;;  %v2011_v10 = vpop.eup %2010  ;;  %v1899_v34 = vpop.f32.mrf.mxu1 }
 0x111   : > { %vm1084_vm1 = vcmp.gt.f32.partialorder %v2280_v36, 0.0  ;;  %v802_v9 = vmin.f32 %v2370_v62, 0.0  ;;  %1436 = vst.msk [vmem:[%s2298_s13 + $0x10] sm:$0xf] %vm1431_vm0, %v1736_v43  ;;  %v1739_v44 = vpack.c.bf16 %v1118_v4, %v1118_v4  ;;  %v1607_v11 = vadd.f32 -1.0, %v2009_v20  ;;  %v2013_v14 = vpop.eup %2012  ;;  %v1867_v28 = vpop.f32.mrf.mxu0 }
 0x112   : > { %v1150_v21 = vsel %vm1086_vm14, %v2266_v25, %v1641_v1  ;;  %v834_v12 = vmin.f32 %v2373_v63, 0.0  ;;  %1468 = vst.msk [vmem:[%s2298_s13 + $0x90] sm:$0xf] %vm1431_vm0, %v1768_v3  ;;  %v1639_v49 = vadd.f32 -1.0, %v2011_v10  ;;  %vm1057_vm2 = vcmp.gt.f32.partialorder %v2284_v41, 0.0  ;;  %v715_v57 = vpop.f32.mrf.mxu1 }
 0x113   : > { %v1771_v24 = vpack.c.bf16 %v1150_v21, %v1150_v21  ;;  %v877_v15 = vmul.f32 1.442695, %v802_v9  ;;  %1439 = vst.msk [vmem:[%s2298_s13 + $0x1c] sm:$0xf] %vm1431_vm0, %v1739_v44  ;;  %v1116_v25 = vsel %vm1052_vm15, %v2277_v35, %v1607_v11  ;;  %v1612_v16 = vadd.f32 -1.0, %v2013_v14  ;;  %v587_v46 = vpop.f32.mrf.mxu0 }
 0x114   : > { %v941_v17 = vmul.f32 1.442695, %v834_v12  ;;  %v2400_v50 = vadd.f32 %v2214_v40, %v571_v33  ;;  %v1737_v19 = vpack.c.bf16 %v1116_v25, %v1116_v25  ;;  %v1148_v55 = vsel %vm1084_vm1, %v2280_v36, %v1639_v49  ;;  %v1902_v4 = vpop.f32.mrf.mxu1 }
 0x115   : > { %1471 = vst.msk [vmem:[%s2298_s13 + $0x9c] sm:$0xf] %vm1431_vm0, %v1771_v24  ;;  %2020 = vpow2.f32 %v877_v15  ;;  %v2408_v23 = vadd.f32 %v2214_v40, %v699_v47  ;;  %v1769_v35 = vpack.c.bf16 %v1148_v55, %v1148_v55  ;;  %v1121_v26 = vsel %vm1057_vm2, %v2284_v41, %v1612_v16  ;;  %v1870_v43 = vpop.f32.mrf.mxu0 }
 0x116   : > { %2022 = vpow2.f32 %v941_v17  ;;  %v800_v27 = vmin.f32 %v2400_v50, 0.0  ;;  %1437 = vst.msk [vmem:[%s2298_s13 + $0x14] sm:$0xf] %vm1431_vm0, %v1737_v19  ;;  %v1742_v30 = vpack.c.bf16 %v1121_v26, %v1121_v26  ;;  %v2015_v31 = vpop.eup %2014  ;;  %v2418_v32 = vadd.f32 %v1866_v59, %v2214_v40  ;;  %v728_v16 = vpop.f32.mrf.mxu1 }
 0x117   : > { %v832_v56 = vmin.f32 %v2408_v23, 0.0  ;;  %1469 = vst.msk [vmem:[%s2298_s13 + $0x94] sm:$0xf] %vm1431_vm0, %v1769_v35  ;;  %v2421_v33 = vadd.f32 %v1898_v2, %v2214_v40  ;;  %v2424_v41 = vadd.f32 %v2214_v40, %v584_v13  ;;  %v1644_v37 = vadd.f32 -1.0, %v2015_v31  ;;  %v600_v11 = vpop.f32.mrf.mxu0 }
 0x118   : > { %v873_v36 = vmul.f32 1.442695, %v800_v27  ;;  %1442 = vst.msk [vmem:[%s2298_s13 + $0x28] sm:$0xf] %vm1431_vm0, %v1742_v30  ;;  %vm1089_vm3 = vcmp.gt.f32.partialorder %v2291_v51, 0.0  ;;  %v2430_v39 = vadd.f32 %v2214_v40, %v712_v18  ;;  %v805_v42 = vmin.f32 %v2418_v32, 0.0 }
 0x119   : > { %v937_v38 = vmul.f32 1.442695, %v832_v56  ;;  %v837_v5 = vmin.f32 %v2421_v33, 0.0  ;;  %v2435_v45 = vadd.f32 %v1867_v28, %v2214_v40  ;;  %v1153_v48 = vsel %vm1089_vm3, %v2291_v51, %v1644_v37  ;;  %v1871_v27 = vpop.f32.mrf.mxu0 }
 0x11a   : > { %2024 = vpow2.f32 %v873_v36  ;;  %v2017_v47 = vpop.eup %2016  ;;  %v803_v52 = vmin.f32 %v2424_v41, 0.0  ;;  %v1774_v6 = vpack.c.bf16 %v1153_v48, %v1153_v48  ;;  %v883_v54 = vmul.f32 1.442695, %v805_v42 }
 0x11b   : > { %2026 = vpow2.f32 %v937_v38  ;;  %v1610_v53 = vadd.f32 -1.0, %v2017_v47  ;;  %v947_v7 = vmul.f32 1.442695, %v837_v5  ;;  %vm1055_vm4 = vcmp.gt.f32.partialorder %v2333_v22, 0.0  ;;  %v603_v48 = vpop.f32.mrf.mxu0 }
 0x11c   : > { %vm1087_vm5 = vcmp.gt.f32.partialorder %v2338_v29, 0.0  ;;  %v879_v59 = vmul.f32 1.442695, %v803_v52  ;;  %v835_v60 = vmin.f32 %v2430_v39, 0.0  ;;  %1474 = vst.msk [vmem:[%s2298_s13 + $0xa8] sm:$0xf] %vm1431_vm0, %v1774_v6  ;;  %2028 = vpow2.f32 %v883_v54 }
 0x11d   : > { %v2019_v58 = vpop.eup %2018  ;;  %v1119_v51 = vsel %vm1055_vm4, %v2333_v22, %v1610_v53  ;;  %v806_v8 = vmin.f32 %v2435_v45, 0.0  ;;  %vm1058_vm6 = vcmp.gt.f32.partialorder %v2370_v62, 0.0  ;;  %2030 = vpow2.f32 %v947_v7 }
 0x11e   : > { %v1642_v61 = vadd.f32 -1.0, %v2019_v58  ;;  %v1740_v0 = vpack.c.bf16 %v1119_v51, %v1119_v51  ;;  %v943_v1 = vmul.f32 1.442695, %v835_v60  ;;  %2032 = vpow2.f32 %v879_v59 }
 0x11f   : > { %v885_v20 = vmul.f32 1.442695, %v806_v8  ;;  %v2449_v3 = vadd.f32 %v1899_v34, %v2214_v40  ;;  %v2454_v9 = vadd.f32 %v2214_v40, %v587_v46  ;;  %v2457_v10 = vadd.f32 %v2214_v40, %v715_v57  ;;  %v1903_v34 = vpop.f32.mrf.mxu1 }
 0x120   : > { %v1151_v2 = vsel %vm1087_vm5, %v2338_v29, %v1642_v61  ;;  %1440 = vst.msk [vmem:[%s2298_s13 + $0x20] sm:$0xf] %vm1431_vm0, %v1740_v0  ;;  %2034 = vpow2.f32 %v943_v1  ;;  %vm1090_vm7 = vcmp.gt.f32.partialorder %v2373_v63, 0.0  ;;  %v2462_v21 = vadd.f32 %v1870_v43, %v2214_v40 }
 0x121   : > { %v1772_v22 = vpack.c.bf16 %v1151_v2, %v1151_v2  ;;  %2036 = vpow2.f32 %v885_v20  ;;  %v838_v29 = vmin.f32 %v2449_v3, 0.0  ;;  %vm1056_vm8 = vcmp.gt.f32.partialorder %v2400_v50, 0.0  ;;  %v731_v60 = vpop.f32.mrf.mxu1  ;;  %v1874_v2 = vpop.f32.mrf.mxu0 }
 0x122   : > { %v2021_v44 = vpop.eup %2020  ;;  %v804_v14 = vmin.f32 %v2454_v9, 0.0  ;;  %v836_v24 = vmin.f32 %v2457_v10, 0.0  ;;  %vm1088_vm9 = vcmp.gt.f32.partialorder %v2408_v23, 0.0  ;;  %v809_v25 = vmin.f32 %v2462_v21, 0.0 }
 0x123   : > { %v2023_v12 = vpop.eup %2022  ;;  %1472 = vst.msk [vmem:[%s2298_s13 + $0xa0] sm:$0xf] %vm1431_vm0, %v1772_v22  ;;  %v1613_v13 = vadd.f32 -1.0, %v2021_v44  ;;  %v949_v15 = vmul.f32 1.442695, %v838_v29  ;;  %vm1061_vm10 = vcmp.gt.f32.partialorder %v2418_v32, 0.0  ;;  %v2483_v56 = vadd.f32 %v2214_v40, %v600_v11 }
 0x124   : > { %v1645_v49 = vadd.f32 -1.0, %v2023_v12  ;;  %v881_v18 = vmul.f32 1.442695, %v804_v14  ;;  %v945_v19 = vmul.f32 1.442695, %v836_v24  ;;  %vm1093_vm11 = vcmp.gt.f32.partialorder %v2421_v33, 0.0 }
 0x125   : > { %v1122_v17 = vsel %vm1058_vm6, %v2370_v62, %v1613_v13  ;;  %2038 = vpow2.f32 %v949_v15  ;;  %v891_v26 = vmul.f32 1.442695, %v809_v25  ;;  %v2480_v62 = vadd.f32 %v1902_v4, %v2214_v40  ;;  %v1906_v13 = vpop.f32.mrf.mxu1  ;;  %v616_v25 = vpop.f32.mrf.mxu0 }
 0x126   : > { %v1743_v55 = vpack.c.bf16 %v1122_v17, %v1122_v17  ;;  %v1154_v35 = vsel %vm1090_vm7, %v2373_v63, %v1645_v49  ;;  %2040 = vpow2.f32 %v881_v18  ;;  %vm1059_vm12 = vcmp.gt.f32.partialorder %v2424_v41, 0.0 }
 0x127   : > { %v2025_v28 = vpop.eup %2024  ;;  %v1775_v30 = vpack.c.bf16 %v1154_v35, %v1154_v35  ;;  %2042 = vpow2.f32 %v945_v19  ;;  %v2489_v63 = vadd.f32 %v2214_v40, %v728_v16  ;;  %v841_v38 = vmin.f32 %v2480_v62, 0.0 }
 0x128   : > { %v2027_v31 = vpop.eup %2026  ;;  %1443 = vst.msk [vmem:[%s2298_s13 + $0x2c] sm:$0xf] %vm1431_vm0, %v1743_v55  ;;  %v1611_v36 = vadd.f32 -1.0, %v2025_v28  ;;  %2044 = vpow2.f32 %v891_v26  ;;  %v2495_v42 = vadd.f32 %v1871_v27, %v2214_v40  ;;  %vm1091_vm13 = vcmp.gt.f32.partialorder %v2430_v39, 0.0  ;;  %v744_v26 = vpop.f32.mrf.mxu1 }
 0x129   : > { %1475 = vst.msk [vmem:[%s2298_s13 + $0xac] sm:$0xf] %vm1431_vm0, %v1775_v30  ;;  %v1643_v37 = vadd.f32 -1.0, %v2027_v31  ;;  %v807_v46 = vmin.f32 %v2483_v56, 0.0  ;;  %v839_v47 = vmin.f32 %v2489_v63, 0.0  ;;  %v2029_v52 = vpop.eup %2028  ;;  %vm1062_vm14 = vcmp.gt.f32.partialorder %v2435_v45, 0.0 }
 0x12a   : > { %v1120_v5 = vsel %vm1056_vm8, %v2400_v50, %v1611_v36  ;;  %v955_v54 = vmul.f32 1.442695, %v841_v38  ;;  %v2031_v7 = vpop.eup %2030  ;;  %v1616_v57 = vadd.f32 -1.0, %v2029_v52  ;;  %vm1094_vm15 = vcmp.gt.f32.partialorder %v2449_v3, 0.0 }
 0x12b   : > { %v1741_v6 = vpack.c.bf16 %v1120_v5, %v1120_v5  ;;  %v1152_v53 = vsel %vm1088_vm9, %v2408_v23, %v1643_v37  ;;  %v887_v58 = vmul.f32 1.442695, %v807_v46  ;;  %v951_v59 = vmul.f32 1.442695, %v839_v47  ;;  %v2033_v51 = vpop.eup %2032  ;;  %v1875_v46 = vpop.f32.mrf.mxu0 }
 0x12c   : > { %v1773_v50 = vpack.c.bf16 %v1152_v53, %v1152_v53  ;;  %v1648_v61 = vadd.f32 -1.0, %v2031_v7  ;;  %2046 = vpow2.f32 %v955_v54  ;;  %v810_v8 = vmin.f32 %v2495_v42, 0.0  ;;  %v1907_v7 = vpop.f32.mrf.mxu1 }
 0x12d   : > { %1441 = vst.msk [vmem:[%s2298_s13 + $0x24] sm:$0xf] %vm1431_vm0, %v1741_v6  ;;  %v2035_v23 = vpop.eup %2034  ;;  %v1125_v43 = vsel %vm1061_vm10, %v2418_v32, %v1616_v57  ;;  %v1614_v0 = vadd.f32 -1.0, %v2033_v51  ;;  %2048 = vpow2.f32 %v887_v58  ;;  %v2517_v1 = vadd.f32 %v1903_v34, %v2214_v40 }
 0x12e   : > { %1473 = vst.msk [vmem:[%s2298_s13 + $0xa4] sm:$0xf] %vm1431_vm0, %v1773_v50  ;;  %v2037_v20 = vpop.eup %2036  ;;  %v1746_v4 = vpack.c.bf16 %v1125_v43, %v1125_v43  ;;  %v1157_v22 = vsel %vm1093_vm11, %v2421_v33, %v1648_v61  ;;  %v1646_v44 = vadd.f32 -1.0, %v2035_v23  ;;  %2050 = vpow2.f32 %v951_v59  ;;  %v619_v59 = vpop.f32.mrf.mxu0 }
 0x12f   : > { %v1778_v29 = vpack.c.bf16 %v1157_v22, %v1157_v22  ;;  %v1123_v32 = vsel %vm1059_vm12, %v2424_v41, %v1614_v0  ;;  %v1617_v11 = vadd.f32 -1.0, %v2037_v20  ;;  %v893_v12 = vmul.f32 1.442695, %v810_v8  ;;  %v747_v20 = vpop.f32.mrf.mxu1 }
 0x130   : > { %1446 = vst.msk [vmem:[%s2298_s13 + $0x38] sm:$0xf] %vm1431_vm0, %v1746_v4  ;;  %v1744_v14 = vpack.c.bf16 %v1123_v32, %v1123_v32  ;;  %v1155_v24 = vsel %vm1091_vm13, %v2430_v39, %v1646_v44  ;;  %vm1060_vm1 = vcmp.gt.f32.partialorder %v2454_v9, 0.0  ;;  %v842_v33 = vmin.f32 %v2517_v1, 0.0 }
 0x131   : > { %1478 = vst.msk [vmem:[%s2298_s13 + $0xb8] sm:$0xf] %vm1431_vm0, %v1778_v29  ;;  %v1776_v49 = vpack.c.bf16 %v1155_v24, %v1155_v24  ;;  %v1126_v41 = vsel %vm1062_vm14, %v2435_v45, %v1617_v11  ;;  %2052 = vpow2.f32 %v893_v12  ;;  %v2538_v15 = vadd.f32 %v2214_v40, %v603_v48 }
 0x132   : > { %v2039_v16 = vpop.eup %2038  ;;  %1444 = vst.msk [vmem:[%s2298_s13 + $0x30] sm:$0xf] %vm1431_vm0, %v1744_v14  ;;  %v1747_v39 = vpack.c.bf16 %v1126_v41, %v1126_v41  ;;  %v957_v17 = vmul.f32 1.442695, %v842_v33  ;;  %v2543_v18 = vadd.f32 %v2214_v40, %v731_v60  ;;  %v2546_v19 = vadd.f32 %v1874_v2, %v2214_v40 }
 0x133   : > { %v2041_v55 = vpop.eup %2040  ;;  %1476 = vst.msk [vmem:[%s2298_s13 + $0xb0] sm:$0xf] %vm1431_vm0, %v1776_v49  ;;  %v1649_v45 = vadd.f32 -1.0, %v2039_v16  ;;  %vm1092_vm2 = vcmp.gt.f32.partialorder %v2457_v10, 0.0  ;;  %vm1065_vm3 = vcmp.gt.f32.partialorder %v2462_v21, 0.0  ;;  %v808_v35 = vmin.f32 %v2538_v15, 0.0 }
 0x134   : > { %v2043_v27 = vpop.eup %2042  ;;  %1447 = vst.msk [vmem:[%s2298_s13 + $0x3c] sm:$0xf] %vm1431_vm0, %v1747_v39  ;;  %v1615_v28 = vadd.f32 -1.0, %v2041_v55  ;;  %2054 = vpow2.f32 %v957_v17  ;;  %v840_v30 = vmin.f32 %v2543_v18, 0.0  ;;  %v2557_v31 = vadd.f32 %v1906_v13, %v2214_v40  ;;  %v1878_v13 = vpop.f32.mrf.mxu0 }
 0x135   : > { %v2045_v36 = vpop.eup %2044  ;;  %v1158_v34 = vsel %vm1094_vm15, %v2449_v3, %v1649_v45  ;;  %v1647_v37 = vadd.f32 -1.0, %v2043_v27  ;;  %v889_v38 = vmul.f32 1.442695, %v808_v35  ;;  %v813_v5 = vmin.f32 %v2546_v19, 0.0 }
 0x136   : > { %v1779_v47 = vpack.c.bf16 %v1158_v34, %v1158_v34  ;;  %v1124_v48 = vsel %vm1060_vm1, %v2454_v9, %v1615_v28  ;;  %v1620_v52 = vadd.f32 -1.0, %v2045_v36  ;;  %v953_v6 = vmul.f32 1.442695, %v840_v30  ;;  %v632_v35 = vpop.f32.mrf.mxu0 }
 0x137   : > { %v1745_v53 = vpack.c.bf16 %v1124_v48, %v1124_v48  ;;  %v1156_v54 = vsel %vm1092_vm2, %v2457_v10, %v1647_v37  ;;  %2056 = vpow2.f32 %v889_v38  ;;  %v899_v3 = vmul.f32 1.442695, %v813_v5 }
 0x138   : > { %1479 = vst.msk [vmem:[%s2298_s13 + $0xbc] sm:$0xf] %vm1431_vm0, %v1779_v47  ;;  %v1777_v50 = vpack.c.bf16 %v1156_v54, %v1156_v54  ;;  %v1129_v57 = vsel %vm1065_vm3, %v2462_v21, %v1620_v52  ;;  %vm1097_vm4 = vcmp.gt.f32.partialorder %v2480_v62, 0.0  ;;  %2058 = vpow2.f32 %v953_v6  ;;  %v1879_v6 = vpop.f32.mrf.mxu0 }
 0x139   : > { %v2047_v9 = vpop.eup %2046  ;;  %1445 = vst.msk [vmem:[%s2298_s13 + $0x34] sm:$0xf] %vm1431_vm0, %v1745_v53  ;;  %v1750_v58 = vpack.c.bf16 %v1129_v57, %v1129_v57  ;;  %vm1063_vm5 = vcmp.gt.f32.partialorder %v2483_v56, 0.0  ;;  %2060 = vpow2.f32 %v899_v3  ;;  %v845_v10 = vmin.f32 %v2557_v31, 0.0 }
 0x13a   : > { %v2049_v60 = vpop.eup %2048  ;;  %1477 = vst.msk [vmem:[%s2298_s13 + $0xb4] sm:$0xf] %vm1431_vm0, %v1777_v50  ;;  %v1652_v51 = vadd.f32 -1.0, %v2047_v9  ;;  %vm1095_vm6 = vcmp.gt.f32.partialorder %v2489_v63, 0.0  ;;  %v2583_v21 = vadd.f32 %v2214_v40, %v616_v25  ;;  %v2586_v61 = vadd.f32 %v2214_v40, %v744_v26 }
 0x13b   : > { %v2051_v8 = vpop.eup %2050  ;;  %1450 = vst.msk [vmem:[%s2298_s13 + $0x48] sm:$0xf] %vm1431_vm0, %v1750_v58  ;;  %v1618_v23 = vadd.f32 -1.0, %v2049_v60  ;;  %v963_v43 = vmul.f32 1.442695, %v845_v10  ;;  %v2591_v0 = vadd.f32 %v1875_v46, %v2214_v40  ;;  %v2594_v2 = vadd.f32 %v1907_v7, %v2214_v40 }
 0x13c   : > { %v1161_v4 = vsel %vm1097_vm4, %v2480_v62, %v1652_v51  ;;  %v1650_v22 = vadd.f32 -1.0, %v2051_v8  ;;  %v811_v44 = vmin.f32 %v2583_v21, 0.0  ;;  %v2601_v29 = vadd.f32 %v2214_v40, %v619_v59 }
 0x13d   : > { %v1782_v32 = vpack.c.bf16 %v1161_v4, %v1161_v4  ;;  %v1127_v11 = vsel %vm1063_vm5, %v2483_v56, %v1618_v23  ;;  %2062 = vpow2.f32 %v963_v43  ;;  %v843_v12 = vmin.f32 %v2586_v61, 0.0  ;;  %v1910_v56 = vpop.f32.mrf.mxu1  ;;  %v635_v23 = vpop.f32.mrf.mxu0 }
 0x13e   : > { %v2053_v14 = vpop.eup %2052  ;;  %v1748_v24 = vpack.c.bf16 %v1127_v11, %v1127_v11  ;;  %v1159_v62 = vsel %vm1095_vm6, %v2489_v63, %v1650_v22  ;;  %v895_v33 = vmul.f32 1.442695, %v811_v44  ;;  %v814_v16 = vmin.f32 %v2591_v0, 0.0  ;;  %v2673_v11 = vld [vmem:[%s2833_s2] ss:$0 sm:$0xff] }
 0x13f   : > { %1482 = vst.msk [vmem:[%s2298_s13 + $0xc8] sm:$0xf] %vm1431_vm0, %v1782_v32  ;;  %v1780_v49 = vpack.c.bf16 %v1159_v62, %v1159_v62  ;;  %v1621_v41 = vadd.f32 -1.0, %v2053_v14  ;;  %v959_v25 = vmul.f32 1.442695, %v843_v12  ;;  %vm1066_vm7 = vcmp.gt.f32.partialorder %v2495_v42, 0.0  ;;  %v760_v37 = vpop.f32.mrf.mxu1 }
 0x140   : > { %1448 = vst.msk [vmem:[%s2298_s13 + $0x40] sm:$0xf] %vm1431_vm0, %v1748_v24  ;;  %vm1098_vm8 = vcmp.gt.f32.partialorder %v2517_v1, 0.0  ;;  %2064 = vpow2.f32 %v895_v33  ;;  %v846_v39 = vmin.f32 %v2594_v2, 0.0  ;;  %v901_v55 = vmul.f32 1.442695, %v814_v16  ;;  %v1882_v16 = vpop.f32.mrf.mxu0 }
 0x141   : > { %v2055_v17 = vpop.eup %2054  ;;  %1480 = vst.msk [vmem:[%s2298_s13 + $0xc0] sm:$0xf] %vm1431_vm0, %v1780_v49  ;;  %v1130_v63 = vsel %vm1066_vm7, %v2495_v42, %v1621_v41  ;;  %2066 = vpow2.f32 %v959_v25  ;;  %v812_v45 = vmin.f32 %v2601_v29, 0.0  ;;  %vm1064_vm9 = vcmp.gt.f32.partialorder %v2538_v15, 0.0  ;;  %v1911_v58 = vpop.f32.mrf.mxu1 }
 0x142   : > { %v1751_v26 = vpack.c.bf16 %v1130_v63, %v1130_v63  ;;  %v1653_v27 = vadd.f32 -1.0, %v2055_v17  ;;  %v965_v28 = vmul.f32 1.442695, %v846_v39  ;;  %2068 = vpow2.f32 %v901_v55 }
 0x143   : > { %v897_v30 = vmul.f32 1.442695, %v812_v45  ;;  %v2624_v36 = vadd.f32 %v2214_v40, %v747_v20  ;;  %v2627_v34 = vadd.f32 %v1878_v13, %v2214_v40  ;;  %vm1096_vm10 = vcmp.gt.f32.partialorder %v2543_v18, 0.0  ;;  %v763_v44 = vpop.f32.mrf.mxu1 }
 0x144   : > { %v2057_v42 = vpop.eup %2056  ;;  %1451 = vst.msk [vmem:[%s2298_s13 + $0x4c] sm:$0xf] %vm1431_vm0, %v1751_v26  ;;  %v1162_v38 = vsel %vm1098_vm8, %v2517_v1, %v1653_v27  ;;  %2070 = vpow2.f32 %v965_v28  ;;  %v2636_v5 = vadd.f32 %v1910_v56, %v2214_v40  ;;  %vm1069_vm11 = vcmp.gt.f32.partialorder %v2546_v19, 0.0 }
 0x145   : > { %v2059_v46 = vpop.eup %2058  ;;  %v1783_v47 = vpack.c.bf16 %v1162_v38, %v1162_v38  ;;  %v1619_v48 = vadd.f32 -1.0, %v2057_v42  ;;  %2072 = vpow2.f32 %v897_v30  ;;  %v844_v52 = vmin.f32 %v2624_v36, 0.0  ;;  %v1914_v30 = vpop.f32.mrf.mxu1 }
 0x146   : > { %v2061_v53 = vpop.eup %2060  ;;  %v1651_v54 = vadd.f32 -1.0, %v2059_v46  ;;  %v817_v3 = vmin.f32 %v2627_v34, 0.0  ;;  %v2642_v1 = vadd.f32 %v2214_v40, %v632_v35  ;;  %v849_v9 = vmin.f32 %v2636_v5, 0.0  ;;  %v648_v46 = vpop.f32.mrf.mxu0 }
 0x147   : > { %1483 = vst.msk [vmem:[%s2298_s13 + $0xcc] sm:$0xf] %vm1431_vm0, %v1783_v47  ;;  %v1128_v7 = vsel %vm1064_vm9, %v2538_v15, %v1619_v48  ;;  %v1624_v50 = vadd.f32 -1.0, %v2061_v53  ;;  %v961_v57 = vmul.f32 1.442695, %v844_v52  ;;  %vm1101_vm12 = vcmp.gt.f32.partialorder %v2557_v31, 0.0 }
 0x148   : > { %v1749_v10 = vpack.c.bf16 %v1128_v7, %v1128_v7  ;;  %v1160_v59 = vsel %vm1096_vm10, %v2543_v18, %v1651_v54  ;;  %v907_v60 = vmul.f32 1.442695, %v817_v3  ;;  %v971_v15 = vmul.f32 1.442695, %v849_v9  ;;  %v776_v7 = vpop.f32.mrf.mxu1 }
 0x149   : > { %v1781_v51 = vpack.c.bf16 %v1160_v59, %v1160_v59  ;;  %v1133_v8 = vsel %vm1069_vm11, %v2546_v19, %v1624_v50  ;;  %2074 = vpow2.f32 %v961_v57  ;;  %vm1067_vm13 = vcmp.gt.f32.partialorder %v2583_v21, 0.0 }
 0x14a   : > { %v2063_v43 = vpop.eup %2062  ;;  %1449 = vst.msk [vmem:[%s2298_s13 + $0x44] sm:$0xf] %vm1431_vm0, %v1749_v10  ;;  %v1754_v20 = vpack.c.bf16 %v1133_v8, %v1133_v8  ;;  %2076 = vpow2.f32 %v907_v60  ;;  %v815_v4 = vmin.f32 %v2642_v1, 0.0  ;;  %v2662_v22 = vadd.f32 %v2214_v40, %v760_v37  ;;  %v1883_v10 = vpop.f32.mrf.mxu0 }
 0x14b   : > { %1481 = vst.msk [vmem:[%s2298_s13 + $0xc4] sm:$0xf] %vm1431_vm0, %v1781_v51  ;;  %v1656_v18 = vadd.f32 -1.0, %v2063_v43  ;;  %2078 = vpow2.f32 %v971_v15  ;;  %v2665_v19 = vadd.f32 %v1879_v6, %v2214_v40  ;;  %vm1099_vm14 = vcmp.gt.f32.partialorder %v2586_v61, 0.0 }
 0x14c   : > { %1454 = vst.msk [vmem:[%s2298_s13 + $0x58] sm:$0xf] %vm1431_vm0, %v1754_v20  ;;  %v903_v32 = vmul.f32 1.442695, %v815_v4  ;;  %v2676_v12 = vadd.f32 %v2673_v11, %v1911_v58  ;;  %v2679_v13 = vadd.f32 %v2673_v11, %v635_v23  ;;  %vm1070_vm15 = vcmp.gt.f32.partialorder %v2591_v0, 0.0 }
 0x14d   : > { %v2065_v14 = vpop.eup %2064  ;;  %v1165_v40 = vsel %vm1101_vm12, %v2557_v31, %v1656_v18  ;;  %v847_v24 = vmin.f32 %v2662_v22, 0.0  ;;  %v818_v62 = vmin.f32 %v2665_v19, 0.0  ;;  %v2688_v25 = vadd.f32 %v2673_v11, %v763_v44 }
 0x14e   : > { %v2067_v33 = vpop.eup %2066  ;;  %v1786_v49 = vpack.c.bf16 %v1165_v40, %v1165_v40  ;;  %v1622_v41 = vadd.f32 -1.0, %v2065_v14  ;;  %2080 = vpow2.f32 %v903_v32  ;;  %v850_v63 = vmin.f32 %v2676_v12, 0.0 }
 0x14f   : > { %v1654_v56 = vadd.f32 -1.0, %v2067_v33  ;;  %v967_v39 = vmul.f32 1.442695, %v847_v24  ;;  %v909_v17 = vmul.f32 1.442695, %v818_v62  ;;  %v2069_v31 = vpop.eup %2068  ;;  %vm1102_vm1 = vcmp.gt.f32.partialorder %v2594_v2, 0.0 }
 0x150   : > { %1486 = vst.msk [vmem:[%s2298_s13 + $0xd8] sm:$0xf] %vm1431_vm0, %v1786_v49  ;;  %v1131_v55 = vsel %vm1067_vm13, %v2583_v21, %v1622_v41  ;;  %vm1068_vm2 = vcmp.gt.f32.partialorder %v2601_v29, 0.0  ;;  %v816_v45 = vmin.f32 %v2679_v13, 0.0  ;;  %v1625_v28 = vadd.f32 -1.0, %v2069_v31  ;;  %v1915_v49 = vpop.f32.mrf.mxu1 }
 0x151   : > { %v2071_v35 = vpop.eup %2070  ;;  %v1752_v26 = vpack.c.bf16 %v1131_v55, %v1131_v55  ;;  %v1163_v27 = vsel %vm1099_vm14, %v2586_v61, %v1654_v56  ;;  %2082 = vpow2.f32 %v967_v39  ;;  %v973_v38 = vmul.f32 1.442695, %v850_v63  ;;  %v651_v39 = vpop.f32.mrf.mxu0 }
 0x152   : > { %v2073_v37 = vpop.eup %2072  ;;  %v1784_v42 = vpack.c.bf16 %v1163_v27, %v1163_v27  ;;  %v1657_v21 = vadd.f32 -1.0, %v2071_v35  ;;  %2084 = vpow2.f32 %v909_v17  ;;  %v1134_v47 = vsel %vm1070_vm15, %v2591_v0, %v1625_v28 }
 0x153   : > { %1452 = vst.msk [vmem:[%s2298_s13 + $0x50] sm:$0xf] %vm1431_vm0, %v1752_v26  ;;  %v1623_v48 = vadd.f32 -1.0, %v2073_v37  ;;  %v905_v52 = vmul.f32 1.442695, %v816_v45  ;;  %v848_v61 = vmin.f32 %v2688_v25, 0.0  ;;  %v1755_v6 = vpack.c.bf16 %v1134_v47, %v1134_v47  ;;  %v779_v37 = vpop.f32.mrf.mxu1 }
 0x154   : > { %1484 = vst.msk [vmem:[%s2298_s13 + $0xd0] sm:$0xf] %vm1431_vm0, %v1784_v42  ;;  %v1166_v53 = vsel %vm1102_vm1, %v2594_v2, %v1657_v21  ;;  %vm1100_vm3 = vcmp.gt.f32.partialorder %v2624_v36, 0.0  ;;  %2086 = vpow2.f32 %v973_v38  ;;  %v2720_v9 = vadd.f32 %v2673_v11, %v1882_v16 }
 0x155   : > { %v1787_v54 = vpack.c.bf16 %v1166_v53, %v1166_v53  ;;  %v1132_v0 = vsel %vm1068_vm2, %v2601_v29, %v1623_v48  ;;  %2088 = vpow2.f32 %v905_v52  ;;  %v969_v3 = vmul.f32 1.442695, %v848_v61  ;;  %1455 = vst.msk [vmem:[%s2298_s13 + $0x5c] sm:$0xf] %vm1431_vm0, %v1755_v6 }
 0x156   : > { %v2075_v50 = vpop.eup %2074  ;;  %v1753_v57 = vpack.c.bf16 %v1132_v0, %v1132_v0  ;;  %v2723_v2 = vadd.f32 %v2673_v11, %v1914_v30  ;;  %v2726_v58 = vadd.f32 %v2673_v11, %v648_v46  ;;  %vm1073_vm4 = vcmp.gt.f32.partialorder %v2627_v34, 0.0 }
 0x157   : > { %v2077_v59 = vpop.eup %2076  ;;  %1487 = vst.msk [vmem:[%s2298_s13 + $0xdc] sm:$0xf] %vm1431_vm0, %v1787_v54  ;;  %v1655_v29 = vadd.f32 -1.0, %v2075_v50  ;;  %vm1105_vm5 = vcmp.gt.f32.partialorder %v2636_v5, 0.0  ;;  %2090 = vpow2.f32 %v969_v3  ;;  %v821_v8 = vmin.f32 %v2720_v9, 0.0 }
 0x158   : > { %v2079_v60 = vpop.eup %2078  ;;  %1453 = vst.msk [vmem:[%s2298_s13 + $0x54] sm:$0xf] %vm1431_vm0, %v1753_v57  ;;  %v1628_v51 = vadd.f32 -1.0, %v2077_v59  ;;  %v853_v15 = vmin.f32 %v2723_v2, 0.0  ;;  %v2737_v23 = vadd.f32 %v2673_v11, %v776_v7  ;;  %v819_v4 = vmin.f32 %v2726_v58, 0.0 }
 0x159   : > { %v1164_v43 = vsel %vm1100_vm3, %v2624_v36, %v1655_v29  ;;  %v1660_v20 = vadd.f32 -1.0, %v2079_v60  ;;  %v2744_v18 = vadd.f32 %v2673_v11, %v1883_v10  ;;  %v915_v14 = vmul.f32 1.442695, %v821_v8 }
 0x15a   : > { %v1785_v44 = vpack.c.bf16 %v1164_v43, %v1164_v43  ;;  %v1137_v32 = vsel %vm1073_vm4, %v2627_v34, %v1628_v51  ;;  %v979_v40 = vmul.f32 1.442695, %v853_v15  ;;  %v911_v36 = vmul.f32 1.442695, %v819_v4 }
 0x15b   : > { %v2081_v24 = vpop.eup %2080  ;;  %v1758_v62 = vpack.c.bf16 %v1137_v32, %v1137_v32  ;;  %v1169_v33 = vsel %vm1105_vm5, %v2636_v5, %v1660_v20  ;;  %2092 = vpow2.f32 %v915_v14  ;;  %v851_v56 = vmin.f32 %v2737_v23, 0.0 }
 0x15c   : > { %1485 = vst.msk [vmem:[%s2298_s13 + $0xd4] sm:$0xf] %vm1431_vm0, %v1785_v44  ;;  %v1790_v41 = vpack.c.bf16 %v1169_v33, %v1169_v33  ;;  %v1626_v16 = vadd.f32 -1.0, %v2081_v24  ;;  %vm1071_vm6 = vcmp.gt.f32.partialorder %v2642_v1, 0.0  ;;  %vm1103_vm7 = vcmp.gt.f32.partialorder %v2662_v22, 0.0 }
 0x15d   : > { %1458 = vst.msk [vmem:[%s2298_s13 + $0x68] sm:$0xf] %vm1431_vm0, %v1758_v62  ;;  %2094 = vpow2.f32 %v979_v40  ;;  %v822_v34 = vmin.f32 %v2744_v18, 0.0  ;;  %v975_v63 = vmul.f32 1.442695, %v851_v56  ;;  %v2762_v31 = vadd.f32 %v2673_v11, %v1915_v49 }
 0x15e   : > { %v2083_v5 = vpop.eup %2082  ;;  %1490 = vst.msk [vmem:[%s2298_s13 + $0xe8] sm:$0xf] %vm1431_vm0, %v1790_v41  ;;  %v1135_v17 = vsel %vm1071_vm6, %v2642_v1, %v1626_v16  ;;  %2096 = vpow2.f32 %v911_v36  ;;  %v2765_v27 = vadd.f32 %v2673_v11, %v651_v39  ;;  %vm1074_vm8 = vcmp.gt.f32.partialorder %v2665_v19, 0.0 }
 0x15f   : > { %v2085_v55 = vpop.eup %2084  ;;  %v1756_v45 = vpack.c.bf16 %v1135_v17, %v1135_v17  ;;  %v1658_v35 = vadd.f32 -1.0, %v2083_v5  ;;  %v917_v26 = vmul.f32 1.442695, %v822_v34  ;;  %2098 = vpow2.f32 %v975_v63 }
 0x160   : > { %v1629_v28 = vadd.f32 -1.0, %v2085_v55  ;;  %v854_v30 = vmin.f32 %v2762_v31, 0.0  ;;  %vm1106_vm9 = vcmp.gt.f32.partialorder %v2676_v12, 0.0  ;;  %v820_v21 = vmin.f32 %v2765_v27, 0.0 }
 0x161   : > { %v2087_v1 = vpop.eup %2086  ;;  %1456 = vst.msk [vmem:[%s2298_s13 + $0x60] sm:$0xf] %vm1431_vm0, %v1756_v45  ;;  %v1167_v42 = vsel %vm1103_vm7, %v2662_v22, %v1658_v35  ;;  %2100 = vpow2.f32 %v917_v26  ;;  %v2778_v54 = vadd.f32 %v2673_v11, %v779_v37  ;;  %vm1072_vm10 = vcmp.gt.f32.partialorder %v2679_v13, 0.0 }
 0x162   : > { %v2089_v38 = vpop.eup %2088  ;;  %v1788_v46 = vpack.c.bf16 %v1167_v42, %v1167_v42  ;;  %v1138_v47 = vsel %vm1074_vm8, %v2665_v19, %v1629_v28  ;;  %v1661_v48 = vadd.f32 -1.0, %v2087_v1  ;;  %v981_v52 = vmul.f32 1.442695, %v854_v30 }
 0x163   : > { %v1759_v61 = vpack.c.bf16 %v1138_v47, %v1138_v47  ;;  %v1627_v6 = vadd.f32 -1.0, %v2089_v38  ;;  %v913_v53 = vmul.f32 1.442695, %v820_v21  ;;  %vm1104_vm11 = vcmp.gt.f32.partialorder %v2688_v25, 0.0 }
 0x164   : > { %v2091_v22 = vpop.eup %2090  ;;  %1488 = vst.msk [vmem:[%s2298_s13 + $0xe0] sm:$0xf] %vm1431_vm0, %v1788_v46  ;;  %v1170_v0 = vsel %vm1106_vm9, %v2676_v12, %v1661_v48  ;;  %2102 = vpow2.f32 %v981_v52  ;;  %v852_v11 = vmin.f32 %v2778_v54, 0.0  ;;  %vm1077_vm12 = vcmp.gt.f32.partialorder %v2720_v9, 0.0 }
 0x165   : > { %1459 = vst.msk [vmem:[%s2298_s13 + $0x6c] sm:$0xf] %vm1431_vm0, %v1759_v61  ;;  %v1791_v19 = vpack.c.bf16 %v1170_v0, %v1170_v0  ;;  %v1136_v3 = vsel %vm1072_vm10, %v2679_v13, %v1627_v6  ;;  %v1659_v7 = vadd.f32 -1.0, %v2091_v22  ;;  %2104 = vpow2.f32 %v913_v53 }
 0x166   : > { %v1757_v50 = vpack.c.bf16 %v1136_v3, %v1136_v3  ;;  %v977_v10 = vmul.f32 1.442695, %v852_v11  ;;  %vm1109_vm13 = vcmp.gt.f32.partialorder %v2723_v2, 0.0  ;;  %vm1075_vm14 = vcmp.gt.f32.partialorder %v2726_v58, 0.0 }
 0x167   : > { %1491 = vst.msk [vmem:[%s2298_s13 + $0xec] sm:$0xf] %vm1431_vm0, %v1791_v19  ;;  %v1168_v12 = vsel %vm1104_vm11, %v2688_v25, %v1659_v7  ;;  %vm1107_vm15 = vcmp.gt.f32.partialorder %v2737_v23, 0.0  ;;  %vm1078_vm1 = vcmp.gt.f32.partialorder %v2744_v18, 0.0  ;;  %vm1110_vm2 = vcmp.gt.f32.partialorder %v2762_v31, 0.0 }
 0x168   : > { %1457 = vst.msk [vmem:[%s2298_s13 + $0x64] sm:$0xf] %vm1431_vm0, %v1757_v50  ;;  %v1789_v57 = vpack.c.bf16 %v1168_v12, %v1168_v12  ;;  %v2093_v59 = vpop.eup %2092  ;;  %2106 = vpow2.f32 %v977_v10  ;;  %vm1076_vm3 = vcmp.gt.f32.partialorder %v2765_v27, 0.0  ;;  %vm1108_vm4 = vcmp.gt.f32.partialorder %v2778_v54, 0.0 }
 0x169   : > { %v1632_v13 = vadd.f32 -1.0, %v2093_v59 }
 0x16a   : > { %v2095_v29 = vpop.eup %2094  ;;  %1489 = vst.msk [vmem:[%s2298_s13 + $0xe4] sm:$0xf] %vm1431_vm0, %v1789_v57 }
 0x16b   : > { %v2097_v60 = vpop.eup %2096  ;;  %v1664_v51 = vadd.f32 -1.0, %v2095_v29  ;;  %v1141_v8 = vsel %vm1077_vm12, %v2720_v9, %v1632_v13 }
 0x16c   : > { %v1630_v25 = vadd.f32 -1.0, %v2097_v60  ;;  %v2099_v15 = vpop.eup %2098  ;;  %v1762_v43 = vpack.c.bf16 %v1141_v8, %v1141_v8 }
 0x16d   : > { %v1173_v20 = vsel %vm1109_vm13, %v2723_v2, %v1664_v51  ;;  %v1662_v14 = vadd.f32 -1.0, %v2099_v15 }
 0x16e   : > { %v2101_v4 = vpop.eup %2100  ;;  %v1794_v44 = vpack.c.bf16 %v1173_v20, %v1173_v20  ;;  %v1139_v32 = vsel %vm1075_vm14, %v2726_v58, %v1630_v25  ;;  %1462 = vst.msk [vmem:[%s2298_s13 + $0x78] sm:$0xf] %vm1431_vm0, %v1762_v43 }
 0x16f   : > { %v1760_v40 = vpack.c.bf16 %v1139_v32, %v1139_v32  ;;  %v1633_v9 = vadd.f32 -1.0, %v2101_v4  ;;  %v1171_v24 = vsel %vm1107_vm15, %v2737_v23, %v1662_v14 }
 0x170   : > { %1494 = vst.msk [vmem:[%s2298_s13 + $0xf8] sm:$0xf] %vm1431_vm0, %v1794_v44  ;;  %v1792_v58 = vpack.c.bf16 %v1171_v24, %v1171_v24 }
 0x171   : > { %v2103_v2 = vpop.eup %2102  ;;  %1460 = vst.msk [vmem:[%s2298_s13 + $0x70] sm:$0xf] %vm1431_vm0, %v1760_v40  ;;  %v1142_v62 = vsel %vm1078_vm1, %v2744_v18, %v1633_v9 }
 0x172   : > { %v2105_v33 = vpop.eup %2104  ;;  %v1763_v36 = vpack.c.bf16 %v1142_v62, %v1142_v62  ;;  %v1665_v49 = vadd.f32 -1.0, %v2103_v2  ;;  %1492 = vst.msk [vmem:[%s2298_s13 + $0xf0] sm:$0xf] %vm1431_vm0, %v1792_v58 }
 0x173   : > { %v1631_v41 = vadd.f32 -1.0, %v2105_v33 }
 0x174   : > { %1463 = vst.msk [vmem:[%s2298_s13 + $0x7c] sm:$0xf] %vm1431_vm0, %v1763_v36  ;;  %v1174_v23 = vsel %vm1110_vm2, %v2762_v31, %v1665_v49 }
 0x175   : > { %v1795_v16 = vpack.c.bf16 %v1174_v23, %v1174_v23  ;;  %v1140_v56 = vsel %vm1076_vm3, %v2765_v27, %v1631_v41  ;;  %v2107_v18 = vpop.eup %2106 }
 0x176   : > { %v1761_v39 = vpack.c.bf16 %v1140_v56, %v1140_v56  ;;  %v1663_v34 = vadd.f32 -1.0, %v2107_v18 }
 0x177   : > { %1495 = vst.msk [vmem:[%s2298_s13 + $0xfc] sm:$0xf] %vm1431_vm0, %v1795_v16 }
 0x178   : > { %1461 = vst.msk [vmem:[%s2298_s13 + $0x74] sm:$0xf] %vm1431_vm0, %v1761_v39  ;;  %v1172_v5 = vsel %vm1108_vm4, %v2778_v54, %v1663_v34 }
 0x179   : > { %v1793_v17 = vpack.c.bf16 %v1172_v5, %v1172_v5 }
 0x17b   : > { %1493 = vst.msk [vmem:[%s2298_s13 + $0xf4] sm:$0xf] %vm1431_vm0, %v1793_v17 }
 0x17c PF: > { %s13_s12 = sadd.s32 1, %s2115_s12  }
 0x17d   : > { %p10_p4 = scmp.ge.s32.totalorder %s13_s12, 6  }
 0x17f   :  { %12 = sbr.rel (!%p10_p4) target bundleno = 1 (0x1), region = 62 }

// kernel: vis_encoder_forward.5
= control target key start
LH: loop header
LB: loop body
LE: loop exit
PB: predicated region body
PF: predicated region fallthrough
CT: control target
= control target key end

     0   :  { %s1334_s12 = smov 0   ;;  %s1668_s0 = inlined_call_operand.vmem [shape: bf16[416,256], index: 0, kind: input, shape index: {}]   ;;  %s1669_s1 = inlined_call_operand.vmem [shape: bf16[256,32], index: 1, kind: input, shape index: {}]   ;;  %s1670_s2 = inlined_call_operand.vmem [shape: f32[1,32], index: 2, kind: input, shape index: {}]   ;;  %s1671_s3 = inlined_call_operand.vmem [shape: bf16[416,32], index: 3, kind: output, shape index: {}]  }
   0x1 LB: > { %s949_s13 = sadd.s32 4294967295, %s1312_s12   ;;  %p953_p0 = scmp.ge.s32.totalorder %s1312_s12, 1  ;;  %s1312_s12 = sphi %s1334_s12, %s13_s12  }
   0x2   : > { %p139_p1 = scmp.lt.s32.totalorder %s1312_s12, 3 }
   0x4   : > { %p140_p2 = pnand %p953_p0, %p139_p1 }
   0x5   : > { %s164_s16 = smul.u32 (!%p140_p2), 26, %s949_s13 }
   0x6   : > { %143 = sbr.rel (%p140_p2) target bundleno = 319 (0x13f), region = 32 }
   0x7   : > { %p165_p3 = scmp.lt.s32.totalorder (!%p140_p2), %s164_s16, 51 }
   0xb   : > { %v1199_v0 = vld [vmem:[%s1669_s1 + $0x78] sm:$0xff]   ;;  %v1201_v2 = vld [vmem:[%s1669_s1 + $0x70] sm:$0xff]   ;;  %v1203_v4 = vld [vmem:[%s1669_s1 + $0x68] sm:$0xff]   ;;  %s1673_s16 = smov (!%p165_p3, %s164_s16), 51  ;;  %vm866_vm1 = vcmask 257024  }
   0xc   : > { %v1200_v1 = vld [vmem:[%s1669_s1 + $0x38] sm:$0xff]   ;;  %1081 = vmatprep.subr.bf16.mxu0 %v1199_v0  ;;  %1175 = vmatprep.subr.bf16.mxu1 %v1199_v0  ;;  %v1202_v3 = vld [vmem:[%s1669_s1 + $0x30] sm:$0xff]   ;;  %v1204_v5 = vld [vmem:[%s1669_s1 + $0x28] sm:$0xff]   ;;  %s1054_s4 = sshll.u32 %s1673_s16, 3  ;;  %s956_s28 = sshll.u32 %s1673_s16, 2 }
   0xd   : > { %1082 = vmatpush3.bf16.msra.mxu0 %v1200_v1  ;;  %1183 = vmatpush3.bf16.msra.mxu1 %v1200_v1  ;;  %v1205_v6 = vld [vmem:[%s1669_s1 + $0x60] sm:$0xff]   ;;  %v1207_v8 = vld [vmem:[%s1669_s1 + $0x58] sm:$0xff]   ;;  %s1375_s9 = scalar_lea.vmem %s1668_s0, %s1054_s4  ;;  %v1209_v10 = vld [vmem:[%s1669_s1 + $0x50] sm:$0xff]   ;;  %s1482_s30 = scalar_lea.vmem %s1671_s3, %s956_s28 }
   0xe   : > { %1083 = vmatprep.subr.bf16.mxu0 %v1201_v2  ;;  %1176 = vmatprep.subr.bf16.mxu1 %v1201_v2  ;;  %v1206_v7 = vld [vmem:[%s1669_s1 + $0x20] sm:$0xff]   ;;  %v1208_v9 = vld [vmem:[%s1669_s1 + $0x18] sm:$0xff]   ;;  %v1210_v13 = vld [vmem:[%s1669_s1 + $0x10] sm:$0xff]  }
   0xf   : > { %v1217_v11 = vld [vmem:[%s1375_s9 + $0x4] ss:$8 sps:$4 sm:$0xff]   ;;  %v1220_v12 = vld [vmem:[%s1375_s9 + $0x74] ss:$8 sps:$4 sm:$0xff]   ;;  %v1215_v18 = vld [vmem:[%s1375_s9] ss:$8 sps:$4 sm:$0xff]  }
  0x10   : > { %v1211_v14 = vld [vmem:[%s1669_s1 + $0x48] sm:$0xff]   ;;  %501 = vmatprep.mubr.bf16.mxu0 %v1217_v11  ;;  %557 = vmatprep.mubr.bf16.mxu1 %v1220_v12  ;;  %v1213_v16 = vld [vmem:[%s1669_s1 + $0x40] sm:$0xff]   ;;  %v1218_v19 = vld [vmem:[%s1375_s9 + $0x70] ss:$8 sps:$4 sm:$0xff]  }
  0x11   : > { %1084 = vmatpush3.bf16.msra.mxu0 %v1202_v3  ;;  %1184 = vmatpush3.bf16.msra.mxu1 %v1202_v3  ;;  %v1212_v15 = vld [vmem:[%s1669_s1 + $0x8] sm:$0xff]   ;;  %v1214_v17 = vld [vmem:[%s1669_s1] sm:$0xff]   ;;  %v1221_v20 = vld [vmem:[%s1375_s9 + $0x14] ss:$8 sps:$4 sm:$0xff]  }
  0x12   : > { %1085 = vmatprep.subr.bf16.mxu0 %v1203_v4  ;;  %1177 = vmatprep.subr.bf16.mxu1 %v1203_v4  ;;  %v1223_v21 = vld [vmem:[%s1375_s9 + $0x84] ss:$8 sps:$4 sm:$0xff]   ;;  %v1225_v22 = vld [vmem:[%s1375_s9 + $0x10] ss:$8 sps:$4 sm:$0xff]   ;;  %v1226_v23 = vld [vmem:[%s1375_s9 + $0x80] ss:$8 sps:$4 sm:$0xff]  }
  0x13   : > { %v1227_v24 = vld [vmem:[%s1375_s9 + $0x24] ss:$8 sps:$4 sm:$0xff]   ;;  %v1229_v25 = vld [vmem:[%s1375_s9 + $0x94] ss:$8 sps:$4 sm:$0xff]   ;;  %v1231_v26 = vld [vmem:[%s1375_s9 + $0x20] ss:$8 sps:$4 sm:$0xff]  }
  0x14   : > { %v1232_v27 = vld [vmem:[%s1375_s9 + $0x90] ss:$8 sps:$4 sm:$0xff]   ;;  %v1233_v28 = vld [vmem:[%s1375_s9 + $0x34] ss:$8 sps:$4 sm:$0xff]   ;;  %v1235_v29 = vld [vmem:[%s1375_s9 + $0xa4] ss:$8 sps:$4 sm:$0xff]  }
  0x15   : > { %1086 = vmatpush3.bf16.msra.mxu0 %v1204_v5  ;;  %1185 = vmatpush3.bf16.msra.mxu1 %v1204_v5  ;;  %v1237_v30 = vld [vmem:[%s1375_s9 + $0x30] ss:$8 sps:$4 sm:$0xff]   ;;  %v1238_v31 = vld [vmem:[%s1375_s9 + $0xa0] ss:$8 sps:$4 sm:$0xff]   ;;  %v1239_v32 = vld [vmem:[%s1375_s9 + $0x44] ss:$8 sps:$4 sm:$0xff]  }
  0x16   : > { %1087 = vmatprep.subr.bf16.mxu0 %v1205_v6  ;;  %1178 = vmatprep.subr.bf16.mxu1 %v1205_v6  ;;  %v1241_v33 = vld [vmem:[%s1375_s9 + $0xb4] ss:$8 sps:$4 sm:$0xff]   ;;  %v1243_v34 = vld [vmem:[%s1375_s9 + $0x40] ss:$8 sps:$4 sm:$0xff]   ;;  %v1244_v35 = vld [vmem:[%s1375_s9 + $0xb0] ss:$8 sps:$4 sm:$0xff]  }
  0x17   : > { %v1245_v36 = vld [vmem:[%s1375_s9 + $0x54] ss:$8 sps:$4 sm:$0xff]   ;;  %v1247_v37 = vld [vmem:[%s1375_s9 + $0xc4] ss:$8 sps:$4 sm:$0xff]   ;;  %v1249_v38 = vld [vmem:[%s1375_s9 + $0x50] ss:$8 sps:$4 sm:$0xff]  }
  0x18   : > { %v1250_v39 = vld [vmem:[%s1375_s9 + $0xc0] ss:$8 sps:$4 sm:$0xff]   ;;  %v1251_v40 = vld [vmem:[%s1375_s9 + $0x64] ss:$8 sps:$4 sm:$0xff]  }
  0x19   : > { %1088 = vmatpush3.bf16.msra.mxu0 %v1206_v7  ;;  %1186 = vmatpush3.bf16.msra.mxu1 %v1206_v7  ;;  %v1253_v41 = vld [vmem:[%s1375_s9 + $0x60] ss:$8 sps:$4 sm:$0xff]  }
  0x1a   : > { %1089 = vmatprep.subr.bf16.mxu0 %v1207_v8  ;;  %1179 = vmatprep.subr.bf16.mxu1 %v1207_v8  ;;  %v1427_v44 = vld [vmem:[%s1670_s2] ss:$0 sm:$0xff] }
  0x1d   : > { %1090 = vmatpush3.bf16.msra.mxu0 %v1208_v9  ;;  %1187 = vmatpush3.bf16.msra.mxu1 %v1208_v9 }
  0x1e   : > { %1091 = vmatprep.subr.bf16.mxu0 %v1209_v10  ;;  %1180 = vmatprep.subr.bf16.mxu1 %v1209_v10 }
  0x21   : > { %1092 = vmatpush3.bf16.msra.mxu0 %v1210_v13  ;;  %1188 = vmatpush3.bf16.msra.mxu1 %v1210_v13 }
  0x22   : > { %1093 = vmatprep.subr.bf16.mxu0 %v1211_v14  ;;  %1181 = vmatprep.subr.bf16.mxu1 %v1211_v14 }
  0x25   : > { %1094 = vmatpush3.bf16.msra.mxu0 %v1212_v15  ;;  %1189 = vmatpush3.bf16.msra.mxu1 %v1212_v15 }
  0x26   : > { %1095 = vmatprep.subr.bf16.mxu0 %v1213_v16  ;;  %1182 = vmatprep.subr.bf16.mxu1 %v1213_v16 }
  0x29   : > { %1096 = vmatpush3.bf16.msra.mxu0 %v1214_v17  ;;  %1190 = vmatpush3.bf16.msra.mxu1 %v1214_v17 }
  0x2c   : > { %502 = vmatmul.mubr.bf16.vlgmr.msra.gmra.mxu0 %v1215_v18  ;;  %558 = vmatmul.mubr.bf16.vlgmr.msra.gmra.mxu1 %v1218_v19 }
  0x2d   : > { %509 = vmatprep.mubr.bf16.mxu0 %v1221_v20  ;;  %565 = vmatprep.mubr.bf16.mxu1 %v1223_v21 }
  0x34   : > { %510 = vmatmul.mubr.bf16.gmra.mxu0 %v1225_v22  ;;  %566 = vmatmul.mubr.bf16.gmra.mxu1 %v1226_v23 }
  0x35   : > { %517 = vmatprep.mubr.bf16.mxu0 %v1227_v24  ;;  %573 = vmatprep.mubr.bf16.mxu1 %v1229_v25 }
  0x3c   : > { %518 = vmatmul.mubr.bf16.gmra.mxu0 %v1231_v26  ;;  %574 = vmatmul.mubr.bf16.gmra.mxu1 %v1232_v27 }
  0x3d   : > { %525 = vmatprep.mubr.bf16.mxu0 %v1233_v28  ;;  %581 = vmatprep.mubr.bf16.mxu1 %v1235_v29 }
  0x44   : > { %526 = vmatmul.mubr.bf16.gmra.mxu0 %v1237_v30  ;;  %582 = vmatmul.mubr.bf16.gmra.mxu1 %v1238_v31 }
  0x45   : > { %533 = vmatprep.mubr.bf16.mxu0 %v1239_v32  ;;  %589 = vmatprep.mubr.bf16.mxu1 %v1241_v33 }
  0x4c   : > { %534 = vmatmul.mubr.bf16.gmra.mxu0 %v1243_v34  ;;  %590 = vmatmul.mubr.bf16.gmra.mxu1 %v1244_v35 }
  0x4d   : > { %541 = vmatprep.mubr.bf16.mxu0 %v1245_v36  ;;  %597 = vmatprep.mubr.bf16.mxu1 %v1247_v37 }
  0x54   : > { %542 = vmatmul.mubr.bf16.gmra.mxu0 %v1249_v38  ;;  %598 = vmatmul.mubr.bf16.gmra.mxu1 %v1250_v39 }
  0x55   : > { %549 = vmatprep.mubr.bf16.mxu0 %v1251_v40 }
  0x5c   : > { %550 = vmatmul.mubr.bf16.gmra.mxu0 %v1253_v41 }
  0xec   : > { %v1097_v42 = vpop.f32.mrf.mxu0  ;;  %v1139_v43 = vpop.f32.mrf.mxu1 }
  0xee   : > { %v1098_v45 = vpop.f32.mrf.mxu0  ;;  %v1140_v46 = vpop.f32.mrf.mxu1 }
  0xef   : > { %v1099_v47 = vadd.f32 %v1098_v45, %v1097_v42  ;;  %v1141_v48 = vadd.f32 %v1140_v46, %v1139_v43 }
  0xf0   : > { %v1100_v49 = vpop.f32.mrf.mxu0  ;;  %v1142_v50 = vpop.f32.mrf.mxu1 }
  0xf1   : > { %v1430_v51 = vadd.f32 %v1099_v47, %v1427_v44  ;;  %v1433_v52 = vadd.f32 %v1141_v48, %v1427_v44 }
  0xf2   : > { %v1101_v53 = vpop.f32.mrf.mxu0  ;;  %v1143_v54 = vpop.f32.mrf.mxu1 }
  0xf3   : > { %v606_v55 = vmin.f32 %v1430_v51, 0.0  ;;  %v620_v56 = vmin.f32 %v1433_v52, 0.0  ;;  %v1102_v57 = vadd.f32 %v1101_v53, %v1100_v49  ;;  %v1144_v58 = vadd.f32 %v1143_v54, %v1142_v50 }
  0xf4   : > { %v1103_v59 = vpop.f32.mrf.mxu0  ;;  %v1145_v60 = vpop.f32.mrf.mxu1  ;;  %vm710_vm0 = vcmp.gt.f32.partialorder %v1430_v51, 0.0  ;;  %vm724_vm2 = vcmp.gt.f32.partialorder %v1433_v52, 0.0 }
  0xf5   : > { %v632_v61 = vmul.f32 1.442695, %v606_v55  ;;  %v660_v62 = vmul.f32 1.442695, %v620_v56  ;;  %v1438_v63 = vadd.f32 %v1102_v57, %v1427_v44  ;;  %v1441_v0 = vadd.f32 %v1144_v58, %v1427_v44 }
  0xf6   : > { %v1104_v1 = vpop.f32.mrf.mxu0  ;;  %v1146_v2 = vpop.f32.mrf.mxu1 }
  0xf7   : > { %1254 = vpow2.f32 %v632_v61  ;;  %v1105_v3 = vadd.f32 %v1104_v1, %v1103_v59  ;;  %v1147_v4 = vadd.f32 %v1146_v2, %v1145_v60  ;;  %v607_v5 = vmin.f32 %v1438_v63, 0.0 }
  0xf8   : > { %1256 = vpow2.f32 %v660_v62  ;;  %v621_v6 = vmin.f32 %v1441_v0, 0.0  ;;  %v1106_v7 = vpop.f32.mrf.mxu0  ;;  %v1148_v8 = vpop.f32.mrf.mxu1  ;;  %vm711_vm3 = vcmp.gt.f32.partialorder %v1438_v63, 0.0  ;;  %vm725_vm4 = vcmp.gt.f32.partialorder %v1441_v0, 0.0 }
  0xf9   : > { %v1446_v9 = vadd.f32 %v1105_v3, %v1427_v44  ;;  %v1449_v10 = vadd.f32 %v1147_v4, %v1427_v44  ;;  %v634_v11 = vmul.f32 1.442695, %v607_v5 }
  0xfa   : > { %v662_v12 = vmul.f32 1.442695, %v621_v6  ;;  %v1107_v13 = vpop.f32.mrf.mxu0  ;;  %v1149_v14 = vpop.f32.mrf.mxu1 }
  0xfb   : > { %v608_v15 = vmin.f32 %v1446_v9, 0.0  ;;  %v622_v16 = vmin.f32 %v1449_v10, 0.0  ;;  %1258 = vpow2.f32 %v634_v11  ;;  %v1108_v17 = vadd.f32 %v1107_v13, %v1106_v7 }
  0xfc   : > { %v1150_v18 = vadd.f32 %v1149_v14, %v1148_v8  ;;  %v1109_v19 = vpop.f32.mrf.mxu0  ;;  %v1151_v20 = vpop.f32.mrf.mxu1  ;;  %1260 = vpow2.f32 %v662_v12  ;;  %vm712_vm5 = vcmp.gt.f32.partialorder %v1446_v9, 0.0  ;;  %vm726_vm6 = vcmp.gt.f32.partialorder %v1449_v10, 0.0 }
  0xfd   : > { %v636_v21 = vmul.f32 1.442695, %v608_v15  ;;  %v664_v22 = vmul.f32 1.442695, %v622_v16  ;;  %v1454_v23 = vadd.f32 %v1108_v17, %v1427_v44 }
  0xfe   : > { %v1457_v24 = vadd.f32 %v1150_v18, %v1427_v44  ;;  %v1110_v25 = vpop.f32.mrf.mxu0  ;;  %v1152_v26 = vpop.f32.mrf.mxu1 }
  0xff   : > { %1262 = vpow2.f32 %v636_v21  ;;  %v1111_v27 = vadd.f32 %v1110_v25, %v1109_v19  ;;  %v1153_v28 = vadd.f32 %v1152_v26, %v1151_v20  ;;  %v609_v29 = vmin.f32 %v1454_v23, 0.0 }
 0x100   : > { %1264 = vpow2.f32 %v664_v22  ;;  %v623_v30 = vmin.f32 %v1457_v24, 0.0  ;;  %v1112_v31 = vpop.f32.mrf.mxu0  ;;  %v1154_v32 = vpop.f32.mrf.mxu1  ;;  %vm713_vm7 = vcmp.gt.f32.partialorder %v1454_v23, 0.0  ;;  %vm727_vm8 = vcmp.gt.f32.partialorder %v1457_v24, 0.0 }
 0x101   : > { %v1462_v33 = vadd.f32 %v1111_v27, %v1427_v44  ;;  %v1465_v34 = vadd.f32 %v1153_v28, %v1427_v44  ;;  %v638_v35 = vmul.f32 1.442695, %v609_v29 }
 0x102   : > { %v666_v36 = vmul.f32 1.442695, %v623_v30  ;;  %v1113_v37 = vpop.f32.mrf.mxu0  ;;  %v1155_v38 = vpop.f32.mrf.mxu1 }
 0x103   : > { %v610_v39 = vmin.f32 %v1462_v33, 0.0  ;;  %v624_v40 = vmin.f32 %v1465_v34, 0.0  ;;  %1266 = vpow2.f32 %v638_v35  ;;  %v1114_v42 = vadd.f32 %v1113_v37, %v1112_v31 }
 0x104   : > { %v1255_v41 = vpop.eup %1254  ;;  %v1156_v43 = vadd.f32 %v1155_v38, %v1154_v32  ;;  %v1115_v45 = vpop.f32.mrf.mxu0  ;;  %1268 = vpow2.f32 %v666_v36  ;;  %vm714_vm9 = vcmp.gt.f32.partialorder %v1462_v33, 0.0  ;;  %vm728_vm10 = vcmp.gt.f32.partialorder %v1465_v34, 0.0 }
 0x105   : > { %v1157_v46 = vpop.f32.mrf.mxu1  ;;  %v1257_v47 = vpop.eup %1256  ;;  %v1000_v48 = vadd.f32 -1.0, %v1255_v41  ;;  %v640_v49 = vmul.f32 1.442695, %v610_v39  ;;  %v668_v50 = vmul.f32 1.442695, %v624_v40  ;;  %v1474_v54 = vadd.f32 %v1114_v42, %v1427_v44 }
 0x106   : > { %v1014_v53 = vadd.f32 -1.0, %v1257_v47  ;;  %v1477_v55 = vadd.f32 %v1156_v43, %v1427_v44  ;;  %v1116_v56 = vpop.f32.mrf.mxu0 }
 0x107   : > { %v1158_v57 = vpop.f32.mrf.mxu1  ;;  %v736_v58 = vsel %vm710_vm0, %v1430_v51, %v1000_v48  ;;  %1270 = vpow2.f32 %v640_v49  ;;  %v1117_v59 = vadd.f32 %v1116_v56, %v1115_v45  ;;  %v611_v1 = vmin.f32 %v1474_v54, 0.0 }
 0x108   : > { %v1159_v60 = vadd.f32 %v1158_v57, %v1157_v46  ;;  %v1055_v61 = vpack.c.bf16 %v736_v58, %v736_v58  ;;  %v750_v62 = vsel %vm724_vm2, %v1433_v52, %v1014_v53  ;;  %1272 = vpow2.f32 %v668_v50  ;;  %v1118_v2 = vpop.f32.mrf.mxu0  ;;  %v1259_v4 = vpop.eup %1258 }
 0x109   : > { %v1160_v3 = vpop.f32.mrf.mxu1  ;;  %v1069_v5 = vpack.c.bf16 %v750_v62, %v750_v62  ;;  %v625_v51 = vmin.f32 %v1477_v55, 0.0  ;;  %v1261_v6 = vpop.eup %1260  ;;  %v1001_v7 = vadd.f32 -1.0, %v1259_v4  ;;  %v642_v8 = vmul.f32 1.442695, %v611_v1 }
 0x10a   : > { %867 = vst.msk [vmem:[%s1482_s30] sm:$0xf] %vm866_vm1, %v1055_v61  ;;  %v1497_v52 = vadd.f32 %v1117_v59, %v1427_v44  ;;  %v1500_v11 = vadd.f32 %v1159_v60, %v1427_v44  ;;  %v1119_v12 = vpop.f32.mrf.mxu0  ;;  %v1015_v14 = vadd.f32 -1.0, %v1261_v6  ;;  %vm715_vm11 = vcmp.gt.f32.partialorder %v1474_v54, 0.0 }
 0x10b   : > { %v1161_v13 = vpop.f32.mrf.mxu1  ;;  %881 = vst.msk [vmem:[%s1482_s30 + $0x38] sm:$0xf] %vm866_vm1, %v1069_v5  ;;  %v670_v15 = vmul.f32 1.442695, %v625_v51  ;;  %v1120_v16 = vadd.f32 %v1119_v12, %v1118_v2  ;;  %v737_v19 = vsel %vm711_vm3, %v1438_v63, %v1001_v7  ;;  %1274 = vpow2.f32 %v642_v8 }
 0x10c   : > { %v1162_v17 = vadd.f32 %v1161_v13, %v1160_v3  ;;  %v1263_v18 = vpop.eup %1262  ;;  %v612_v20 = vmin.f32 %v1497_v52, 0.0  ;;  %v1121_v21 = vpop.f32.mrf.mxu0  ;;  %v1056_v26 = vpack.c.bf16 %v737_v19, %v737_v19  ;;  %v751_v27 = vsel %vm725_vm4, %v1441_v0, %v1015_v14 }
 0x10d   : > { %v1163_v22 = vpop.f32.mrf.mxu1  ;;  %v1265_v25 = vpop.eup %1264  ;;  %v1002_v28 = vadd.f32 -1.0, %v1263_v18  ;;  %1276 = vpow2.f32 %v670_v15  ;;  %v1070_v29 = vpack.c.bf16 %v751_v27, %v751_v27  ;;  %v626_v31 = vmin.f32 %v1500_v11, 0.0 }
 0x10e   : > { %v1016_v30 = vadd.f32 -1.0, %v1265_v25  ;;  %v644_v63 = vmul.f32 1.442695, %v612_v20  ;;  %v1122_v32 = vpop.f32.mrf.mxu0  ;;  %868 = vst.msk [vmem:[%s1482_s30 + $0x4] sm:$0xf] %vm866_vm1, %v1056_v26  ;;  %v1520_v0 = vadd.f32 %v1120_v16, %v1427_v44  ;;  %v1523_v37 = vadd.f32 %v1162_v17, %v1427_v44 }
 0x10f   : > { %v1164_v35 = vpop.f32.mrf.mxu1  ;;  %v738_v36 = vsel %vm712_vm5, %v1446_v9, %v1002_v28  ;;  %882 = vst.msk [vmem:[%s1482_s30 + $0x3c] sm:$0xf] %vm866_vm1, %v1070_v29  ;;  %v672_v40 = vmul.f32 1.442695, %v626_v31  ;;  %vm729_vm12 = vcmp.gt.f32.partialorder %v1477_v55, 0.0  ;;  %vm716_vm13 = vcmp.gt.f32.partialorder %v1497_v52, 0.0 }
 0x110   : > { %v1057_v38 = vpack.c.bf16 %v738_v36, %v738_v36  ;;  %v752_v39 = vsel %vm726_vm6, %v1449_v10, %v1016_v30  ;;  %1278 = vpow2.f32 %v644_v63  ;;  %v1124_v9 = vpop.f32.mrf.mxu0  ;;  %v1267_v42 = vpop.eup %1266  ;;  %v613_v45 = vmin.f32 %v1520_v0, 0.0 }
 0x111   : > { %v1166_v41 = vpop.f32.mrf.mxu1  ;;  %v1071_v43 = vpack.c.bf16 %v752_v39, %v752_v39  ;;  %v627_v46 = vmin.f32 %v1523_v37, 0.0  ;;  %v1269_v47 = vpop.eup %1268  ;;  %v1003_v48 = vadd.f32 -1.0, %v1267_v42  ;;  %1280 = vpow2.f32 %v672_v40 }
 0x112   : > { %869 = vst.msk [vmem:[%s1482_s30 + $0x8] sm:$0xf] %vm866_vm1, %v1057_v38  ;;  %v1123_v10 = vadd.f32 %v1122_v32, %v1121_v21  ;;  %v1125_v49 = vpop.f32.mrf.mxu0  ;;  %v1017_v53 = vadd.f32 -1.0, %v1269_v47  ;;  %v646_v56 = vmul.f32 1.442695, %v613_v45  ;;  %v1165_v58 = vadd.f32 %v1164_v35, %v1163_v22 }
 0x113   : > { %v1167_v50 = vpop.f32.mrf.mxu1  ;;  %883 = vst.msk [vmem:[%s1482_s30 + $0x40] sm:$0xf] %vm866_vm1, %v1071_v43  ;;  %v674_v57 = vmul.f32 1.442695, %v627_v46  ;;  %v739_v60 = vsel %vm713_vm7, %v1454_v23, %v1003_v48  ;;  %v1126_v62 = vadd.f32 %v1125_v49, %v1124_v9  ;;  %vm730_vm14 = vcmp.gt.f32.partialorder %v1500_v11, 0.0 }
 0x114   : > { %v1271_v59 = vpop.eup %1270  ;;  %v1542_v61 = vadd.f32 %v1123_v10, %v1427_v44  ;;  %v1168_v1 = vadd.f32 %v1167_v50, %v1166_v41  ;;  %v1127_v2 = vpop.f32.mrf.mxu0  ;;  %v1058_v5 = vpack.c.bf16 %v739_v60, %v739_v60  ;;  %v753_v51 = vsel %vm727_vm8, %v1457_v24, %v1017_v53 }
 0x115   : > { %v1169_v3 = vpop.f32.mrf.mxu1  ;;  %v1273_v4 = vpop.eup %1272  ;;  %v1004_v6 = vadd.f32 -1.0, %v1271_v59  ;;  %1282 = vpow2.f32 %v646_v56  ;;  %v1072_v7 = vpack.c.bf16 %v753_v51, %v753_v51  ;;  %v1555_v24 = vadd.f32 %v1165_v58, %v1427_v44 }
 0x116   : > { %v1018_v8 = vadd.f32 -1.0, %v1273_v4  ;;  %1284 = vpow2.f32 %v674_v57  ;;  %v614_v23 = vmin.f32 %v1542_v61, 0.0  ;;  %v1128_v12 = vpop.f32.mrf.mxu0  ;;  %870 = vst.msk [vmem:[%s1482_s30 + $0xc] sm:$0xf] %vm866_vm1, %v1058_v5  ;;  %v1558_v15 = vadd.f32 %v1126_v62, %v1427_v44 }
 0x117   : > { %v1170_v13 = vpop.f32.mrf.mxu1  ;;  %v740_v14 = vsel %vm714_vm9, %v1462_v33, %v1004_v6  ;;  %884 = vst.msk [vmem:[%s1482_s30 + $0x44] sm:$0xf] %vm866_vm1, %v1072_v7  ;;  %v1564_v19 = vadd.f32 %v1168_v1, %v1427_v44  ;;  %v628_v25 = vmin.f32 %v1555_v24, 0.0  ;;  %v1129_v36 = vadd.f32 %v1128_v12, %v1127_v2 }
 0x118   : > { %v1059_v16 = vpack.c.bf16 %v740_v14, %v740_v14  ;;  %v754_v17 = vsel %vm728_vm10, %v1465_v34, %v1018_v8  ;;  %v648_v18 = vmul.f32 1.442695, %v614_v23  ;;  %v1130_v33 = vpop.f32.mrf.mxu0  ;;  %v1275_v21 = vpop.eup %1274  ;;  %v615_v26 = vmin.f32 %v1558_v15, 0.0 }
 0x119   : > { %v1172_v20 = vpop.f32.mrf.mxu1  ;;  %v1073_v22 = vpack.c.bf16 %v754_v17, %v754_v17  ;;  %v1005_v28 = vadd.f32 -1.0, %v1275_v21  ;;  %v629_v34 = vmin.f32 %v1564_v19, 0.0  ;;  %v676_v63 = vmul.f32 1.442695, %v628_v25 }
 0x11a   : > { %v1277_v27 = vpop.eup %1276  ;;  %871 = vst.msk [vmem:[%s1482_s30 + $0x10] sm:$0xf] %vm866_vm1, %v1059_v16  ;;  %1286 = vpow2.f32 %v648_v18  ;;  %v1131_v29 = vpop.f32.mrf.mxu0  ;;  %v650_v31 = vmul.f32 1.442695, %v615_v26  ;;  %v1171_v38 = vadd.f32 %v1170_v13, %v1169_v3  ;;  %vm717_vm15 = vcmp.gt.f32.partialorder %v1520_v0, 0.0 }
 0x11b   : > { %885 = vst.msk [vmem:[%s1482_s30 + $0x48] sm:$0xf] %vm866_vm1, %v1073_v22  ;;  %v1019_v30 = vadd.f32 -1.0, %v1277_v27  ;;  %v741_v32 = vsel %vm715_vm11, %v1474_v54, %v1005_v28  ;;  %v678_v35 = vmul.f32 1.442695, %v629_v34  ;;  %v1173_v39 = vpop.f32.mrf.mxu1  ;;  %1288 = vpow2.f32 %v676_v63 }
 0x11c   : > { %v1133_v40 = vpop.f32.mrf.mxu0  ;;  %v1060_v41 = vpack.c.bf16 %v741_v32, %v741_v32  ;;  %v1132_v43 = vadd.f32 %v1131_v29, %v1130_v33  ;;  %1290 = vpow2.f32 %v650_v31  ;;  %v1581_v54 = vadd.f32 %v1129_v36, %v1427_v44 }
 0x11d   : > { %v1279_v9 = vpop.eup %1278  ;;  %v755_v42 = vsel %vm729_vm12, %v1477_v55, %v1019_v30  ;;  %1292 = vpow2.f32 %v678_v35  ;;  %v1586_v10 = vadd.f32 %v1171_v38, %v1427_v44  ;;  %v1174_v55 = vadd.f32 %v1173_v39, %v1172_v20 }
 0x11e   : > { %v1074_v45 = vpack.c.bf16 %v755_v42, %v755_v42  ;;  %v1006_v46 = vadd.f32 -1.0, %v1279_v9  ;;  %v1134_v47 = vpop.f32.mrf.mxu0  ;;  %v1281_v48 = vpop.eup %1280  ;;  %872 = vst.msk [vmem:[%s1482_s30 + $0x14] sm:$0xf] %vm866_vm1, %v1060_v41  ;;  %v1589_v49 = vadd.f32 %v1132_v43, %v1427_v44  ;;  %v616_v56 = vmin.f32 %v1581_v54, 0.0 }
 0x11f   : > { %v1020_v53 = vadd.f32 -1.0, %v1281_v48  ;;  %v630_v59 = vmin.f32 %v1586_v10, 0.0  ;;  %vm731_vm0 = vcmp.gt.f32.partialorder %v1523_v37, 0.0  ;;  %v1135_v12 = vadd.f32 %v1134_v47, %v1133_v40 }
 0x120   : > { %886 = vst.msk [vmem:[%s1482_s30 + $0x4c] sm:$0xf] %vm866_vm1, %v1074_v45  ;;  %v742_v50 = vsel %vm716_vm13, %v1497_v52, %v1006_v46  ;;  %v1136_v57 = vpop.f32.mrf.mxu0  ;;  %v617_v60 = vmin.f32 %v1589_v49, 0.0  ;;  %v652_v2 = vmul.f32 1.442695, %v616_v56  ;;  %v1603_v52 = vadd.f32 %v1174_v55, %v1427_v44 }
 0x121   : > { %v1061_v58 = vpack.c.bf16 %v742_v50, %v742_v50  ;;  %v756_v1 = vsel %vm730_vm14, %v1500_v11, %v1020_v53  ;;  %v680_v6 = vmul.f32 1.442695, %v630_v59  ;;  %v1614_v20 = vadd.f32 %v1135_v12, %v1427_v44 }
 0x122   : > { %v1283_v62 = vpop.eup %1282  ;;  %v1137_v3 = vpop.f32.mrf.mxu0  ;;  %v1075_v5 = vpack.c.bf16 %v756_v1, %v756_v1  ;;  %v654_v7 = vmul.f32 1.442695, %v617_v60  ;;  %1294 = vpow2.f32 %v652_v2  ;;  %v631_v11 = vmin.f32 %v1603_v52, 0.0 }
 0x123   : > { %v1285_v4 = vpop.eup %1284  ;;  %873 = vst.msk [vmem:[%s1482_s30 + $0x18] sm:$0xf] %vm866_vm1, %v1061_v58  ;;  %v1007_v51 = vadd.f32 -1.0, %v1283_v62  ;;  %1296 = vpow2.f32 %v680_v6  ;;  %v1138_v13 = vadd.f32 %v1137_v3, %v1136_v57  ;;  %vm718_vm2 = vcmp.gt.f32.partialorder %v1542_v61, 0.0 }
 0x124   : > { %v1021_v8 = vadd.f32 -1.0, %v1285_v4  ;;  %887 = vst.msk [vmem:[%s1482_s30 + $0x50] sm:$0xf] %vm866_vm1, %v1075_v5  ;;  %1298 = vpow2.f32 %v654_v7  ;;  %v682_v17 = vmul.f32 1.442695, %v631_v11  ;;  %vm732_vm3 = vcmp.gt.f32.partialorder %v1555_v24, 0.0 }
 0x125   : > { %v743_v23 = vsel %vm717_vm15, %v1520_v0, %v1007_v51  ;;  %v1617_v21 = vadd.f32 %v1138_v13, %v1427_v44  ;;  %v618_v0 = vmin.f32 %v1614_v20, 0.0  ;;  %vm719_vm4 = vcmp.gt.f32.partialorder %v1558_v15, 0.0 }
 0x126   : > { %v1062_v14 = vpack.c.bf16 %v743_v23, %v743_v23  ;;  %v757_v16 = vsel %vm731_vm0, %v1523_v37, %v1021_v8  ;;  %1300 = vpow2.f32 %v682_v17  ;;  %vm733_vm5 = vcmp.gt.f32.partialorder %v1564_v19, 0.0 }
 0x127   : > { %v1287_v18 = vpop.eup %1286  ;;  %v1076_v33 = vpack.c.bf16 %v757_v16, %v757_v16  ;;  %v619_v37 = vmin.f32 %v1617_v21, 0.0  ;;  %v656_v34 = vmul.f32 1.442695, %v618_v0  ;;  %vm720_vm6 = vcmp.gt.f32.partialorder %v1581_v54, 0.0 }
 0x128   : > { %874 = vst.msk [vmem:[%s1482_s30 + $0x1c] sm:$0xf] %vm866_vm1, %v1062_v14  ;;  %v1008_v22 = vadd.f32 -1.0, %v1287_v18  ;;  %v1289_v25 = vpop.eup %1288  ;;  %vm734_vm7 = vcmp.gt.f32.partialorder %v1586_v10, 0.0  ;;  %vm721_vm8 = vcmp.gt.f32.partialorder %v1589_v49, 0.0  ;;  %vm735_vm9 = vcmp.gt.f32.partialorder %v1603_v52, 0.0 }
 0x129   : > { %888 = vst.msk [vmem:[%s1482_s30 + $0x54] sm:$0xf] %vm866_vm1, %v1076_v33  ;;  %v1291_v27 = vpop.eup %1290  ;;  %v1022_v44 = vadd.f32 -1.0, %v1289_v25  ;;  %v658_v29 = vmul.f32 1.442695, %v619_v37  ;;  %1302 = vpow2.f32 %v656_v34  ;;  %vm722_vm10 = vcmp.gt.f32.partialorder %v1614_v20, 0.0 }
 0x12a   : > { %v744_v26 = vsel %vm718_vm2, %v1542_v61, %v1008_v22  ;;  %v1293_v30 = vpop.eup %1292  ;;  %v1009_v63 = vadd.f32 -1.0, %v1291_v27  ;;  %vm723_vm11 = vcmp.gt.f32.partialorder %v1617_v21, 0.0 }
 0x12b   : > { %v1063_v28 = vpack.c.bf16 %v744_v26, %v744_v26  ;;  %v758_v31 = vsel %vm732_vm3, %v1555_v24, %v1022_v44  ;;  %v1023_v32 = vadd.f32 -1.0, %v1293_v30  ;;  %1304 = vpow2.f32 %v658_v29 }
 0x12c   : > { %v1077_v61 = vpack.c.bf16 %v758_v31, %v758_v31  ;;  %v745_v35 = vsel %vm719_vm4, %v1558_v15, %v1009_v63 }
 0x12d   : > { %875 = vst.msk [vmem:[%s1482_s30 + $0x20] sm:$0xf] %vm866_vm1, %v1063_v28  ;;  %v1064_v36 = vpack.c.bf16 %v745_v35, %v745_v35  ;;  %v759_v38 = vsel %vm733_vm5, %v1564_v19, %v1023_v32 }
 0x12e   : > { %889 = vst.msk [vmem:[%s1482_s30 + $0x58] sm:$0xf] %vm866_vm1, %v1077_v61  ;;  %v1078_v39 = vpack.c.bf16 %v759_v38, %v759_v38 }
 0x12f   : > { %v1295_v40 = vpop.eup %1294  ;;  %876 = vst.msk [vmem:[%s1482_s30 + $0x24] sm:$0xf] %vm866_vm1, %v1064_v36 }
 0x130   : > { %v1297_v24 = vpop.eup %1296  ;;  %890 = vst.msk [vmem:[%s1482_s30 + $0x5c] sm:$0xf] %vm866_vm1, %v1078_v39  ;;  %v1010_v9 = vadd.f32 -1.0, %v1295_v40 }
 0x131   : > { %v1299_v41 = vpop.eup %1298  ;;  %v1024_v15 = vadd.f32 -1.0, %v1297_v24 }
 0x132   : > { %v746_v42 = vsel %vm720_vm6, %v1581_v54, %v1010_v9  ;;  %v1011_v19 = vadd.f32 -1.0, %v1299_v41 }
 0x133   : > { %v1301_v43 = vpop.eup %1300  ;;  %v1065_v45 = vpack.c.bf16 %v746_v42, %v746_v42  ;;  %v760_v46 = vsel %vm734_vm7, %v1586_v10, %v1024_v15 }
 0x134   : > { %v1079_v47 = vpack.c.bf16 %v760_v46, %v760_v46  ;;  %v747_v48 = vsel %vm721_vm8, %v1589_v49, %v1011_v19  ;;  %v1025_v55 = vadd.f32 -1.0, %v1301_v43 }
 0x135   : > { %877 = vst.msk [vmem:[%s1482_s30 + $0x28] sm:$0xf] %vm866_vm1, %v1065_v45  ;;  %v1066_v50 = vpack.c.bf16 %v747_v48, %v747_v48 }
 0x136   : > { %891 = vst.msk [vmem:[%s1482_s30 + $0x60] sm:$0xf] %vm866_vm1, %v1079_v47  ;;  %v761_v54 = vsel %vm735_vm9, %v1603_v52, %v1025_v55  ;;  %v1303_v53 = vpop.eup %1302 }
 0x137   : > { %878 = vst.msk [vmem:[%s1482_s30 + $0x2c] sm:$0xf] %vm866_vm1, %v1066_v50  ;;  %v1080_v10 = vpack.c.bf16 %v761_v54, %v761_v54  ;;  %v1012_v49 = vadd.f32 -1.0, %v1303_v53 }
 0x138   : > { %v1305_v56 = vpop.eup %1304 }
 0x139   : > { %892 = vst.msk [vmem:[%s1482_s30 + $0x64] sm:$0xf] %vm866_vm1, %v1080_v10  ;;  %v1013_v57 = vadd.f32 -1.0, %v1305_v56  ;;  %v748_v58 = vsel %vm722_vm10, %v1614_v20, %v1012_v49 }
 0x13a   : > { %v1067_v59 = vpack.c.bf16 %v748_v58, %v748_v58 }
 0x13b   : > { %v749_v60 = vsel %vm723_vm11, %v1617_v21, %v1013_v57 }
 0x13c   : > { %v1068_v62 = vpack.c.bf16 %v749_v60, %v749_v60  ;;  %879 = vst.msk [vmem:[%s1482_s30 + $0x30] sm:$0xf] %vm866_vm1, %v1067_v59 }
 0x13e   : > { %880 = vst.msk [vmem:[%s1482_s30 + $0x34] sm:$0xf] %vm866_vm1, %v1068_v62 }
 0x13f PF: > { %s13_s12 = sadd.s32 1, %s1312_s12  }
 0x140   : > { %p10_p4 = scmp.ge.s32.totalorder %s13_s12, 4  }
 0x142   :  { %12 = sbr.rel (!%p10_p4) target bundleno = 1 (0x1), region = 62 }

// kernel: vis_encoder_forward.6
= control target key start
LH: loop header
LB: loop body
LE: loop exit
PB: predicated region body
PF: predicated region fallthrough
CT: control target
= control target key end

     0   :  { %s990_s12 = smov 0   ;;  %s1126_s0 = inlined_call_operand.vmem [shape: bf16[96,512], index: 0, kind: input, shape index: {}]   ;;  %s1127_s1 = inlined_call_operand.vmem [shape: bf16[512,64], index: 1, kind: input, shape index: {}]   ;;  %s1128_s2 = inlined_call_operand.vmem [shape: f32[1,64], index: 2, kind: input, shape index: {}]   ;;  %s1129_s3 = inlined_call_operand.vmem [shape: bf16[96,64], index: 3, kind: output, shape index: {}]  }
   0x1 LB: > { %s750_s13 = sadd.s32 4294967295, %s968_s12   ;;  %p754_p0 = scmp.ge.s32.totalorder %s968_s12, 1  ;;  %s968_s12 = sphi %s990_s12, %s13_s12  }
   0x2   : > { %p139_p1 = scmp.lt.s32.totalorder %s968_s12, 3 }
   0x4   : > { %p140_p2 = pnand %p754_p0, %p139_p1 }
   0x5   : > { %s164_s19 = smul.u32 (!%p140_p2), 6, %s750_s13 }
   0x6   : > { %143 = sbr.rel (%p140_p2) target bundleno = 290 (0x122), region = 32 }
   0x7   : > { %p165_p3 = scmp.lt.s32.totalorder (!%p140_p2), %s164_s19, 11 }
   0xb   : > { %v900_v0 = vld [vmem:[%s1127_s1 + $0x78] sm:$0xff]   ;;  %v904_v4 = vld [vmem:[%s1127_s1 + $0x70] sm:$0xff]   ;;  %v908_v8 = vld [vmem:[%s1127_s1 + $0x68] sm:$0xff]   ;;  %s1131_s19 = smov (!%p165_p3, %s164_s19), 11  ;;  %vm687_vm1 = vcmask 519168  }
   0xc   : > { %v901_v1 = vld [vmem:[%s1127_s1 + $0xf8] sm:$0xff]   ;;  %824 = vmatprep.subr.bf16.mxu0 %v900_v0  ;;  %v905_v5 = vld [vmem:[%s1127_s1 + $0xf0] sm:$0xff]   ;;  %v909_v9 = vld [vmem:[%s1127_s1 + $0xe8] sm:$0xff]   ;;  %s817_s18 = sshll.u32 %s1131_s19, 4  ;;  %s757_s7 = sshll.u32 %s1131_s19, 2 }
   0xd   : > { %v902_v2 = vld [vmem:[%s1127_s1 + $0x38] sm:$0xff]   ;;  %858 = vmatprep.subr.bf16.mxu1 %v901_v1  ;;  %v906_v6 = vld [vmem:[%s1127_s1 + $0x30] sm:$0xff]   ;;  %v910_v10 = vld [vmem:[%s1127_s1 + $0x28] sm:$0xff]   ;;  %s169_s13 = scalar_lea.vmem %s1126_s0, %s817_s18  ;;  %s1109_s10 = scalar_lea.vmem %s1129_s3, %s757_s7 }
   0xe   : > { %v903_v3 = vld [vmem:[%s1127_s1 + $0xb8] sm:$0xff]   ;;  %825 = vmatpush3.bf16.msra.mxu0 %v902_v2  ;;  %v907_v7 = vld [vmem:[%s1127_s1 + $0xb0] sm:$0xff]   ;;  %v911_v11 = vld [vmem:[%s1127_s1 + $0xa8] sm:$0xff]  }
   0xf   : > { %859 = vmatpush3.bf16.msra.mxu1 %v903_v3  ;;  %826 = vmatprep.subr.bf16.mxu0 %v904_v4  ;;  %v912_v12 = vld [vmem:[%s1127_s1 + $0x60] sm:$0xff]   ;;  %v916_v16 = vld [vmem:[%s1127_s1 + $0x58] sm:$0xff]   ;;  %v920_v20 = vld [vmem:[%s1127_s1 + $0x50] sm:$0xff]  }
  0x10   : > { %860 = vmatprep.subr.bf16.mxu1 %v905_v5  ;;  %v913_v13 = vld [vmem:[%s1127_s1 + $0xe0] sm:$0xff]   ;;  %v917_v17 = vld [vmem:[%s1127_s1 + $0xd8] sm:$0xff]   ;;  %v921_v21 = vld [vmem:[%s1127_s1 + $0xd0] sm:$0xff]  }
  0x11   : > { %v914_v14 = vld [vmem:[%s1127_s1 + $0x20] sm:$0xff]   ;;  %v918_v18 = vld [vmem:[%s1127_s1 + $0x18] sm:$0xff]   ;;  %v922_v22 = vld [vmem:[%s1127_s1 + $0x10] sm:$0xff]  }
  0x12   : > { %827 = vmatpush3.bf16.msra.mxu0 %v906_v6  ;;  %v915_v15 = vld [vmem:[%s1127_s1 + $0xa0] sm:$0xff]   ;;  %v919_v19 = vld [vmem:[%s1127_s1 + $0x98] sm:$0xff]   ;;  %v923_v23 = vld [vmem:[%s1127_s1 + $0x90] sm:$0xff]  }
  0x13   : > { %861 = vmatpush3.bf16.msra.mxu1 %v907_v7  ;;  %828 = vmatprep.subr.bf16.mxu0 %v908_v8  ;;  %v924_v24 = vld [vmem:[%s1127_s1 + $0x48] sm:$0xff]   ;;  %v928_v28 = vld [vmem:[%s1127_s1 + $0x40] sm:$0xff]  }
  0x14   : > { %862 = vmatprep.subr.bf16.mxu1 %v909_v9  ;;  %v925_v25 = vld [vmem:[%s1127_s1 + $0xc8] sm:$0xff]   ;;  %v929_v29 = vld [vmem:[%s1127_s1 + $0xc0] sm:$0xff]  }
  0x15   : > { %v926_v26 = vld [vmem:[%s1127_s1 + $0x8] sm:$0xff]   ;;  %v930_v30 = vld [vmem:[%s1127_s1] sm:$0xff]  }
  0x16   : > { %829 = vmatpush3.bf16.msra.mxu0 %v910_v10  ;;  %v927_v27 = vld [vmem:[%s1127_s1 + $0x88] sm:$0xff]   ;;  %v931_v31 = vld [vmem:[%s1127_s1 + $0x80] sm:$0xff]  }
  0x17   : > { %863 = vmatpush3.bf16.msra.mxu1 %v911_v11  ;;  %830 = vmatprep.subr.bf16.mxu0 %v912_v12  ;;  %v932_v32 = vld [vmem:[%s169_s13] ss:$16 sps:$4 sm:$0xff]   ;;  %v934_v33 = vld [vmem:[%s169_s13 + $0x4] ss:$16 sps:$4 sm:$0xff]   ;;  %v935_v34 = vld [vmem:[%s169_s13 + $0x8] ss:$16 sps:$4 sm:$0xff]  }
  0x18   : > { %864 = vmatprep.subr.bf16.mxu1 %v913_v13  ;;  %v937_v35 = vld [vmem:[%s169_s13 + $0xc] ss:$16 sps:$4 sm:$0xff]   ;;  %545 = vmatprep.mubr.bf16.mxu0 %v934_v33  ;;  %v938_v36 = vld [vmem:[%s169_s13 + $0x24] ss:$16 sps:$4 sm:$0xff]   ;;  %v942_v38 = vld [vmem:[%s169_s13 + $0x20] ss:$16 sps:$4 sm:$0xff]  }
  0x19   : > { %602 = vmatprep.mubr.bf16.mxu1 %v937_v35  ;;  %v940_v37 = vld [vmem:[%s169_s13 + $0x2c] ss:$16 sps:$4 sm:$0xff]   ;;  %v943_v39 = vld [vmem:[%s169_s13 + $0x28] ss:$16 sps:$4 sm:$0xff]   ;;  %v944_v40 = vld [vmem:[%s169_s13 + $0x44] ss:$16 sps:$4 sm:$0xff]  }
  0x1a   : > { %831 = vmatpush3.bf16.msra.mxu0 %v914_v14  ;;  %v946_v41 = vld [vmem:[%s169_s13 + $0x4c] ss:$16 sps:$4 sm:$0xff]   ;;  %v948_v42 = vld [vmem:[%s169_s13 + $0x40] ss:$16 sps:$4 sm:$0xff]   ;;  %v949_v43 = vld [vmem:[%s169_s13 + $0x48] ss:$16 sps:$4 sm:$0xff]  }
  0x1b   : > { %865 = vmatpush3.bf16.msra.mxu1 %v915_v15  ;;  %832 = vmatprep.subr.bf16.mxu0 %v916_v16  ;;  %v758_v46 = vld [vmem:[%s1128_s2] ss:$0 sm:$0xff] }
  0x1c   : > { %866 = vmatprep.subr.bf16.mxu1 %v917_v17 }
  0x1e   : > { %833 = vmatpush3.bf16.msra.mxu0 %v918_v18 }
  0x1f   : > { %867 = vmatpush3.bf16.msra.mxu1 %v919_v19  ;;  %834 = vmatprep.subr.bf16.mxu0 %v920_v20 }
  0x20   : > { %868 = vmatprep.subr.bf16.mxu1 %v921_v21 }
  0x22   : > { %835 = vmatpush3.bf16.msra.mxu0 %v922_v22 }
  0x23   : > { %869 = vmatpush3.bf16.msra.mxu1 %v923_v23  ;;  %836 = vmatprep.subr.bf16.mxu0 %v924_v24 }
  0x24   : > { %870 = vmatprep.subr.bf16.mxu1 %v925_v25 }
  0x26   : > { %837 = vmatpush3.bf16.msra.mxu0 %v926_v26 }
  0x27   : > { %871 = vmatpush3.bf16.msra.mxu1 %v927_v27  ;;  %838 = vmatprep.subr.bf16.mxu0 %v928_v28 }
  0x28   : > { %872 = vmatprep.subr.bf16.mxu1 %v929_v29 }
  0x2a   : > { %839 = vmatpush3.bf16.msra.mxu0 %v930_v30 }
  0x2b   : > { %873 = vmatpush3.bf16.msra.mxu1 %v931_v31 }
  0x2d   : > { %546 = vmatmul.mubr.bf16.vlgmr.msra.gmra.mxu0 %v932_v32 }
  0x2e   : > { %603 = vmatmul.mubr.bf16.vlgmr.msra.gmra.mxu1 %v935_v34  ;;  %553 = vmatprep.mubr.bf16.mxu0 %v938_v36 }
  0x2f   : > { %610 = vmatprep.mubr.bf16.mxu1 %v940_v37 }
  0x35   : > { %554 = vmatmul.mubr.bf16.gmra.mxu0 %v942_v38 }
  0x36   : > { %611 = vmatmul.mubr.bf16.gmra.mxu1 %v943_v39  ;;  %561 = vmatprep.mubr.bf16.mxu0 %v944_v40 }
  0x37   : > { %618 = vmatprep.mubr.bf16.mxu1 %v946_v41 }
  0x3d   : > { %562 = vmatmul.mubr.bf16.gmra.mxu0 %v948_v42 }
  0x3e   : > { %619 = vmatmul.mubr.bf16.gmra.mxu1 %v949_v43 }
  0xed   : > { %v840_v44 = vpop.f32.mrf.mxu0 }
  0xee   : > { %v874_v45 = vpop.f32.mrf.mxu1 }
  0xef   : > { %v841_v47 = vpop.f32.mrf.mxu0 }
  0xf0   : > { %v842_v48 = vadd.f32 %v841_v47, %v840_v44  ;;  %v875_v49 = vpop.f32.mrf.mxu1 }
  0xf1   : > { %v843_v50 = vpop.f32.mrf.mxu0  ;;  %v876_v52 = vadd.f32 %v875_v49, %v874_v45 }
  0xf2   : > { %v548_v51 = vadd.f32 %v842_v48, %v758_v46  ;;  %v877_v53 = vpop.f32.mrf.mxu1 }
  0xf3   : > { %v844_v54 = vpop.f32.mrf.mxu0 }
  0xf4   : > { %v605_v55 = vadd.f32 %v876_v52, %v548_v51  ;;  %v845_v56 = vadd.f32 %v844_v54, %v843_v50  ;;  %v878_v57 = vpop.f32.mrf.mxu1 }
  0xf5   : > { %v846_v58 = vpop.f32.mrf.mxu0  ;;  %v879_v61 = vadd.f32 %v878_v57, %v877_v53 }
  0xf6   : > { %v627_v59 = vmin.f32 %v605_v55, 0.0  ;;  %v551_v60 = vadd.f32 %v845_v56, %v758_v46  ;;  %v880_v62 = vpop.f32.mrf.mxu1  ;;  %vm651_vm0 = vcmp.gt.f32.partialorder %v605_v55, 0.0 }
  0xf7   : > { %v847_v63 = vpop.f32.mrf.mxu0 }
  0xf8   : > { %v633_v0 = vmul.f32 1.442695, %v627_v59  ;;  %v608_v1 = vadd.f32 %v879_v61, %v551_v60  ;;  %v848_v2 = vadd.f32 %v847_v63, %v846_v58  ;;  %v881_v3 = vpop.f32.mrf.mxu1 }
  0xf9   : > { %v849_v4 = vpop.f32.mrf.mxu0  ;;  %v882_v7 = vadd.f32 %v881_v3, %v880_v62 }
  0xfa   : > { %950 = vpow2.f32 %v633_v0  ;;  %v628_v5 = vmin.f32 %v608_v1, 0.0  ;;  %v556_v6 = vadd.f32 %v848_v2, %v758_v46  ;;  %v883_v8 = vpop.f32.mrf.mxu1  ;;  %vm652_vm2 = vcmp.gt.f32.partialorder %v608_v1, 0.0 }
  0xfb   : > { %v850_v9 = vpop.f32.mrf.mxu0 }
  0xfc   : > { %v635_v10 = vmul.f32 1.442695, %v628_v5  ;;  %v613_v11 = vadd.f32 %v882_v7, %v556_v6  ;;  %v851_v12 = vadd.f32 %v850_v9, %v849_v4  ;;  %v884_v13 = vpop.f32.mrf.mxu1 }
  0xfd   : > { %v852_v14 = vpop.f32.mrf.mxu0  ;;  %v885_v17 = vadd.f32 %v884_v13, %v883_v8 }
  0xfe   : > { %952 = vpow2.f32 %v635_v10  ;;  %v629_v15 = vmin.f32 %v613_v11, 0.0  ;;  %v559_v16 = vadd.f32 %v851_v12, %v758_v46  ;;  %v886_v18 = vpop.f32.mrf.mxu1  ;;  %vm653_vm3 = vcmp.gt.f32.partialorder %v613_v11, 0.0 }
  0xff   : > { %v853_v19 = vpop.f32.mrf.mxu0 }
 0x100   : > { %v637_v20 = vmul.f32 1.442695, %v629_v15  ;;  %v616_v21 = vadd.f32 %v885_v17, %v559_v16  ;;  %v854_v22 = vadd.f32 %v853_v19, %v852_v14  ;;  %v887_v23 = vpop.f32.mrf.mxu1 }
 0x101   : > { %v855_v24 = vpop.f32.mrf.mxu0  ;;  %v888_v27 = vadd.f32 %v887_v23, %v886_v18 }
 0x102   : > { %954 = vpow2.f32 %v637_v20  ;;  %v630_v25 = vmin.f32 %v616_v21, 0.0  ;;  %v564_v26 = vadd.f32 %v854_v22, %v758_v46  ;;  %v889_v28 = vpop.f32.mrf.mxu1  ;;  %vm654_vm4 = vcmp.gt.f32.partialorder %v616_v21, 0.0 }
 0x103   : > { %v856_v29 = vpop.f32.mrf.mxu0 }
 0x104   : > { %v639_v30 = vmul.f32 1.442695, %v630_v25  ;;  %v621_v31 = vadd.f32 %v888_v27, %v564_v26  ;;  %v857_v32 = vadd.f32 %v856_v29, %v855_v24  ;;  %v890_v33 = vpop.f32.mrf.mxu1 }
 0x105   : > { %v891_v36 = vadd.f32 %v890_v33, %v889_v28 }
 0x106   : > { %956 = vpow2.f32 %v639_v30  ;;  %v631_v34 = vmin.f32 %v621_v31, 0.0  ;;  %v567_v35 = vadd.f32 %v857_v32, %v758_v46  ;;  %vm655_vm5 = vcmp.gt.f32.partialorder %v621_v31, 0.0 }
 0x107   : > { %v951_v37 = vpop.eup %950 }
 0x108   : > { %v803_v38 = vadd.f32 -1.0, %v951_v37  ;;  %v641_v39 = vmul.f32 1.442695, %v631_v34  ;;  %v624_v40 = vadd.f32 %v891_v36, %v567_v35 }
 0x10a   : > { %v657_v41 = vsel %vm651_vm0, %v605_v55, %v803_v38  ;;  %958 = vpow2.f32 %v641_v39  ;;  %v632_v42 = vmin.f32 %v624_v40, 0.0  ;;  %vm656_vm6 = vcmp.gt.f32.partialorder %v624_v40, 0.0 }
 0x10b   : > { %v953_v43 = vpop.eup %952  ;;  %v818_v44 = vpack.c.bf16 %v657_v41, %v657_v41 }
 0x10c   : > { %v804_v45 = vadd.f32 -1.0, %v953_v43  ;;  %v643_v46 = vmul.f32 1.442695, %v632_v42 }
 0x10d   : > { %688 = vst.msk [vmem:[%s1109_s10] sm:$0xf] %vm687_vm1, %v818_v44 }
 0x10e   : > { %v658_v47 = vsel %vm652_vm2, %v608_v1, %v804_v45  ;;  %960 = vpow2.f32 %v643_v46 }
 0x10f   : > { %v955_v48 = vpop.eup %954  ;;  %v819_v49 = vpack.c.bf16 %v658_v47, %v658_v47 }
 0x110   : > { %v805_v50 = vadd.f32 -1.0, %v955_v48 }
 0x111   : > { %689 = vst.msk [vmem:[%s1109_s10 + $0x4] sm:$0xf] %vm687_vm1, %v819_v49 }
 0x112   : > { %v659_v51 = vsel %vm653_vm3, %v613_v11, %v805_v50 }
 0x113   : > { %v957_v52 = vpop.eup %956  ;;  %v820_v53 = vpack.c.bf16 %v659_v51, %v659_v51 }
 0x114   : > { %v806_v54 = vadd.f32 -1.0, %v957_v52 }
 0x115   : > { %690 = vst.msk [vmem:[%s1109_s10 + $0x8] sm:$0xf] %vm687_vm1, %v820_v53 }
 0x116   : > { %v660_v55 = vsel %vm654_vm4, %v616_v21, %v806_v54 }
 0x117   : > { %v959_v56 = vpop.eup %958  ;;  %v821_v57 = vpack.c.bf16 %v660_v55, %v660_v55 }
 0x118   : > { %v807_v58 = vadd.f32 -1.0, %v959_v56 }
 0x119   : > { %691 = vst.msk [vmem:[%s1109_s10 + $0xc] sm:$0xf] %vm687_vm1, %v821_v57 }
 0x11a   : > { %v661_v59 = vsel %vm655_vm5, %v621_v31, %v807_v58 }
 0x11b   : > { %v961_v60 = vpop.eup %960  ;;  %v822_v61 = vpack.c.bf16 %v661_v59, %v661_v59 }
 0x11c   : > { %v808_v62 = vadd.f32 -1.0, %v961_v60 }
 0x11d   : > { %692 = vst.msk [vmem:[%s1109_s10 + $0x10] sm:$0xf] %vm687_vm1, %v822_v61 }
 0x11e   : > { %v662_v63 = vsel %vm656_vm6, %v624_v40, %v808_v62 }
 0x11f   : > { %v823_v0 = vpack.c.bf16 %v662_v63, %v662_v63 }
 0x121   : > { %693 = vst.msk [vmem:[%s1109_s10 + $0x14] sm:$0xf] %vm687_vm1, %v823_v0 }
 0x122 PF: > { %s13_s12 = sadd.s32 1, %s968_s12  }
 0x123   : > { %p10_p4 = scmp.ge.s32.totalorder %s13_s12, 4  }
 0x125   :  { %12 = sbr.rel (!%p10_p4) target bundleno = 1 (0x1), region = 62 }

// kernel: vis_encoder_forward.7
= control target key start
LH: loop header
LB: loop body
LE: loop exit
PB: predicated region body
PF: predicated region fallthrough
CT: control target
= control target key end

     0   :  { %s1240_s1 = inlined_call_operand.vmem [shape: bf16[1024,128], index: 1, kind: input, shape index: {}]   ;;  %s1241_s0 = inlined_call_operand.vmem [shape: bf16[16,1024], index: 0, kind: input, shape index: {}]   ;;  %s1242_s2 = inlined_call_operand.vmem [shape: f32[1,128], index: 2, kind: input, shape index: {}]   ;;  %s1243_s3 = inlined_call_operand.vmem [shape: f32[16,128], index: 3, kind: output, shape index: {}]  }
   0x1   :  { %v927_v0 = vld [vmem:[%s1240_s1 + $0x78] sm:$0xff]   ;;  %v931_v4 = vld [vmem:[%s1240_s1 + $0x70] sm:$0xff]   ;;  %v935_v8 = vld [vmem:[%s1240_s1 + $0x68] sm:$0xff]  }
   0x2   :  { %v928_v1 = vld [vmem:[%s1240_s1 + $0xf8] sm:$0xff]   ;;  %839 = vmatprep.subr.bf16.mxu0 %v927_v0  ;;  %v932_v5 = vld [vmem:[%s1240_s1 + $0xf0] sm:$0xff]   ;;  %v936_v9 = vld [vmem:[%s1240_s1 + $0xe8] sm:$0xff]  }
   0x3   :  { %v929_v2 = vld [vmem:[%s1240_s1 + $0x38] sm:$0xff]   ;;  %861 = vmatprep.subr.bf16.mxu1 %v928_v1  ;;  %v933_v6 = vld [vmem:[%s1240_s1 + $0x30] sm:$0xff]   ;;  %v937_v10 = vld [vmem:[%s1240_s1 + $0x28] sm:$0xff]  }
   0x4   :  { %v930_v3 = vld [vmem:[%s1240_s1 + $0xb8] sm:$0xff]   ;;  %840 = vmatpush3.bf16.msra.mxu0 %v929_v2  ;;  %v934_v7 = vld [vmem:[%s1240_s1 + $0xb0] sm:$0xff]   ;;  %v938_v11 = vld [vmem:[%s1240_s1 + $0xa8] sm:$0xff]  }
   0x5   :  { %862 = vmatpush3.bf16.msra.mxu1 %v930_v3  ;;  %841 = vmatprep.subr.bf16.mxu0 %v931_v4  ;;  %v939_v12 = vld [vmem:[%s1240_s1 + $0x60] sm:$0xff]   ;;  %v943_v16 = vld [vmem:[%s1240_s1 + $0x58] sm:$0xff]   ;;  %v947_v20 = vld [vmem:[%s1240_s1 + $0x50] sm:$0xff]  }
   0x6   :  { %863 = vmatprep.subr.bf16.mxu1 %v932_v5  ;;  %v940_v13 = vld [vmem:[%s1240_s1 + $0xe0] sm:$0xff]   ;;  %v944_v17 = vld [vmem:[%s1240_s1 + $0xd8] sm:$0xff]   ;;  %v948_v21 = vld [vmem:[%s1240_s1 + $0xd0] sm:$0xff]  }
   0x7   :  { %v941_v14 = vld [vmem:[%s1240_s1 + $0x20] sm:$0xff]   ;;  %v945_v18 = vld [vmem:[%s1240_s1 + $0x18] sm:$0xff]   ;;  %v949_v22 = vld [vmem:[%s1240_s1 + $0x10] sm:$0xff]  }
   0x8   :  { %842 = vmatpush3.bf16.msra.mxu0 %v933_v6  ;;  %v942_v15 = vld [vmem:[%s1240_s1 + $0xa0] sm:$0xff]   ;;  %v946_v19 = vld [vmem:[%s1240_s1 + $0x98] sm:$0xff]   ;;  %v950_v23 = vld [vmem:[%s1240_s1 + $0x90] sm:$0xff]  }
   0x9   :  { %864 = vmatpush3.bf16.msra.mxu1 %v934_v7  ;;  %843 = vmatprep.subr.bf16.mxu0 %v935_v8  ;;  %v951_v24 = vld [vmem:[%s1240_s1 + $0x48] sm:$0xff]   ;;  %v955_v28 = vld [vmem:[%s1240_s1 + $0x40] sm:$0xff]   ;;  %v959_v40 = vld [vmem:[%s1240_s1 + $0x178] sm:$0xff]  }
   0xa   :  { %865 = vmatprep.subr.bf16.mxu1 %v936_v9  ;;  %v952_v25 = vld [vmem:[%s1240_s1 + $0xc8] sm:$0xff]   ;;  %v956_v29 = vld [vmem:[%s1240_s1 + $0xc0] sm:$0xff]   ;;  %v960_v41 = vld [vmem:[%s1240_s1 + $0x1f8] sm:$0xff]  }
   0xb   :  { %v953_v26 = vld [vmem:[%s1240_s1 + $0x8] sm:$0xff]   ;;  %v957_v30 = vld [vmem:[%s1240_s1] sm:$0xff]   ;;  %v961_v42 = vld [vmem:[%s1240_s1 + $0x138] sm:$0xff]  }
   0xc   :  { %844 = vmatpush3.bf16.msra.mxu0 %v937_v10  ;;  %v954_v27 = vld [vmem:[%s1240_s1 + $0x88] sm:$0xff]   ;;  %v958_v31 = vld [vmem:[%s1240_s1 + $0x80] sm:$0xff]   ;;  %v962_v43 = vld [vmem:[%s1240_s1 + $0x1b8] sm:$0xff]  }
   0xd   :  { %866 = vmatpush3.bf16.msra.mxu1 %v938_v11  ;;  %845 = vmatprep.subr.bf16.mxu0 %v939_v12  ;;  %v15_v32 = vld [vmem:[%s1241_s0] sm:$0xff]  ;;  %v16_v34 = vld [vmem:[%s1241_s0 + $0x8] sm:$0xff]  ;;  %v963_v44 = vld [vmem:[%s1240_s1 + $0x170] sm:$0xff]  }
   0xe   :  { %867 = vmatprep.subr.bf16.mxu1 %v940_v13  ;;  %v19_v33 = vld [vmem:[%s1241_s0 + $0x20] sm:$0xff]  ;;  %v20_v37 = vld [vmem:[%s1241_s0 + $0x28] sm:$0xff]  ;;  %v964_v45 = vld [vmem:[%s1240_s1 + $0x1f0] sm:$0xff]  }
   0xf   :  { %v765_v35 = vcombine.low %v15_v32, %v19_v33  ;;  %v766_v36 = vcombine.high %v15_v32, %v19_v33  ;;  %v767_v38 = vcombine.low %v16_v34, %v20_v37  ;;  %v768_v39 = vcombine.high %v16_v34, %v20_v37  ;;  %v965_v46 = vld [vmem:[%s1240_s1 + $0x130] sm:$0xff]   ;;  %v967_v48 = vld [vmem:[%s1240_s1 + $0x168] sm:$0xff]   ;;  %v971_v52 = vld [vmem:[%s1240_s1 + $0x160] sm:$0xff]  }
  0x10   :  { %846 = vmatpush3.bf16.msra.mxu0 %v941_v14  ;;  %v966_v47 = vld [vmem:[%s1240_s1 + $0x1b0] sm:$0xff]   ;;  %v968_v49 = vld [vmem:[%s1240_s1 + $0x1e8] sm:$0xff]   ;;  %v972_v53 = vld [vmem:[%s1240_s1 + $0x1e0] sm:$0xff]  }
  0x11   :  { %868 = vmatpush3.bf16.msra.mxu1 %v942_v15  ;;  %847 = vmatprep.subr.bf16.mxu0 %v943_v16  ;;  %v969_v50 = vld [vmem:[%s1240_s1 + $0x128] sm:$0xff]   ;;  %v973_v54 = vld [vmem:[%s1240_s1 + $0x120] sm:$0xff]   ;;  %v975_v56 = vld [vmem:[%s1240_s1 + $0x158] sm:$0xff]  }
  0x12   :  { %869 = vmatprep.subr.bf16.mxu1 %v944_v17  ;;  %614 = vmatprep.mubr.bf16.mxu0 %v766_v36  ;;  %v970_v51 = vld [vmem:[%s1240_s1 + $0x1a8] sm:$0xff]   ;;  %v974_v55 = vld [vmem:[%s1240_s1 + $0x1a0] sm:$0xff]   ;;  %v976_v57 = vld [vmem:[%s1240_s1 + $0x1d8] sm:$0xff]  }
  0x13   :  { %655 = vmatprep.mubr.bf16.mxu1 %v768_v39  ;;  %v977_v58 = vld [vmem:[%s1240_s1 + $0x118] sm:$0xff]   ;;  %v979_v60 = vld [vmem:[%s1240_s1 + $0x150] sm:$0xff]   ;;  %v983_v0 = vld [vmem:[%s1240_s1 + $0x148] sm:$0xff]  }
  0x14   :  { %848 = vmatpush3.bf16.msra.mxu0 %v945_v18  ;;  %v978_v59 = vld [vmem:[%s1240_s1 + $0x198] sm:$0xff]   ;;  %v980_v61 = vld [vmem:[%s1240_s1 + $0x1d0] sm:$0xff]   ;;  %v984_v1 = vld [vmem:[%s1240_s1 + $0x1c8] sm:$0xff]  }
  0x15   :  { %870 = vmatpush3.bf16.msra.mxu1 %v946_v19  ;;  %849 = vmatprep.subr.bf16.mxu0 %v947_v20  ;;  %v981_v62 = vld [vmem:[%s1240_s1 + $0x110] sm:$0xff]   ;;  %v985_v2 = vld [vmem:[%s1240_s1 + $0x108] sm:$0xff]   ;;  %v987_v4 = vld [vmem:[%s1240_s1 + $0x140] sm:$0xff]  }
  0x16   :  { %871 = vmatprep.subr.bf16.mxu1 %v948_v21  ;;  %v982_v63 = vld [vmem:[%s1240_s1 + $0x190] sm:$0xff]   ;;  %v986_v3 = vld [vmem:[%s1240_s1 + $0x188] sm:$0xff]   ;;  %v988_v5 = vld [vmem:[%s1240_s1 + $0x1c0] sm:$0xff]  }
  0x17   :  { %v989_v6 = vld [vmem:[%s1240_s1 + $0x100] sm:$0xff]   ;;  %v17_v8 = vld [vmem:[%s1241_s0 + $0x10] sm:$0xff]  ;;  %v18_v12 = vld [vmem:[%s1241_s0 + $0x18] sm:$0xff] }
  0x18   :  { %850 = vmatpush3.bf16.msra.mxu0 %v949_v22  ;;  %v990_v7 = vld [vmem:[%s1240_s1 + $0x180] sm:$0xff]   ;;  %v21_v9 = vld [vmem:[%s1241_s0 + $0x30] sm:$0xff]  ;;  %v22_v13 = vld [vmem:[%s1241_s0 + $0x38] sm:$0xff] }
  0x19   :  { %872 = vmatpush3.bf16.msra.mxu1 %v950_v23  ;;  %851 = vmatprep.subr.bf16.mxu0 %v951_v24  ;;  %v769_v10 = vcombine.low %v17_v8, %v21_v9  ;;  %v770_v11 = vcombine.high %v17_v8, %v21_v9  ;;  %v771_v14 = vcombine.low %v18_v12, %v22_v13  ;;  %v764_v23 = vld [vmem:[%s1242_s2] ss:$0 sm:$0xff] }
  0x1a   :  { %873 = vmatprep.subr.bf16.mxu1 %v952_v25  ;;  %v772_v15 = vcombine.high %v18_v12, %v22_v13 }
  0x1c   :  { %852 = vmatpush3.bf16.msra.mxu0 %v953_v26 }
  0x1d   :  { %874 = vmatpush3.bf16.msra.mxu1 %v954_v27  ;;  %853 = vmatprep.subr.bf16.mxu0 %v955_v28 }
  0x1e   :  { %875 = vmatprep.subr.bf16.mxu1 %v956_v29 }
  0x20   :  { %854 = vmatpush3.bf16.msra.mxu0 %v957_v30 }
  0x21   :  { %876 = vmatpush3.bf16.msra.mxu1 %v958_v31  ;;  %883 = vmatprep.subr.bf16.mxu0 %v959_v40 }
  0x22   :  { %905 = vmatprep.subr.bf16.mxu1 %v960_v41 }
  0x23   :  { %615 = vmatmul.mubr.bf16.vlgmr.msra.gmra.mxu0 %v765_v35 }
  0x24   :  { %656 = vmatmul.mubr.bf16.vlgmr.msra.gmra.mxu1 %v767_v38  ;;  %884 = vmatpush3.bf16.msra.mxu0 %v961_v42 }
  0x25   :  { %906 = vmatpush3.bf16.msra.mxu1 %v962_v43  ;;  %885 = vmatprep.subr.bf16.mxu0 %v963_v44 }
  0x26   :  { %907 = vmatprep.subr.bf16.mxu1 %v964_v45  ;;  %696 = vmatprep.mubr.bf16.mxu0 %v770_v11 }
  0x27   :  { %737 = vmatprep.mubr.bf16.mxu1 %v772_v15 }
  0x28   :  { %886 = vmatpush3.bf16.msra.mxu0 %v965_v46 }
  0x29   :  { %908 = vmatpush3.bf16.msra.mxu1 %v966_v47  ;;  %887 = vmatprep.subr.bf16.mxu0 %v967_v48 }
  0x2a   :  { %909 = vmatprep.subr.bf16.mxu1 %v968_v49 }
  0x2c   :  { %888 = vmatpush3.bf16.msra.mxu0 %v969_v50 }
  0x2d   :  { %910 = vmatpush3.bf16.msra.mxu1 %v970_v51  ;;  %889 = vmatprep.subr.bf16.mxu0 %v971_v52 }
  0x2e   :  { %911 = vmatprep.subr.bf16.mxu1 %v972_v53 }
  0x30   :  { %890 = vmatpush3.bf16.msra.mxu0 %v973_v54 }
  0x31   :  { %912 = vmatpush3.bf16.msra.mxu1 %v974_v55  ;;  %891 = vmatprep.subr.bf16.mxu0 %v975_v56 }
  0x32   :  { %913 = vmatprep.subr.bf16.mxu1 %v976_v57 }
  0x34   :  { %892 = vmatpush3.bf16.msra.mxu0 %v977_v58 }
  0x35   :  { %914 = vmatpush3.bf16.msra.mxu1 %v978_v59  ;;  %893 = vmatprep.subr.bf16.mxu0 %v979_v60 }
  0x36   :  { %915 = vmatprep.subr.bf16.mxu1 %v980_v61 }
  0x38   :  { %894 = vmatpush3.bf16.msra.mxu0 %v981_v62 }
  0x39   :  { %916 = vmatpush3.bf16.msra.mxu1 %v982_v63  ;;  %895 = vmatprep.subr.bf16.mxu0 %v983_v0 }
  0x3a   :  { %917 = vmatprep.subr.bf16.mxu1 %v984_v1 }
  0x3c   :  { %896 = vmatpush3.bf16.msra.mxu0 %v985_v2 }
  0x3d   :  { %918 = vmatpush3.bf16.msra.mxu1 %v986_v3  ;;  %897 = vmatprep.subr.bf16.mxu0 %v987_v4 }
  0x3e   :  { %919 = vmatprep.subr.bf16.mxu1 %v988_v5 }
  0x40   :  { %898 = vmatpush3.bf16.msra.mxu0 %v989_v6 }
  0x41   :  { %920 = vmatpush3.bf16.msra.mxu1 %v990_v7 }
  0x43   :  { %697 = vmatmul.mubr.bf16.vlgmr.msra.gmra.mxu0 %v769_v10 }
  0x44   :  { %738 = vmatmul.mubr.bf16.vlgmr.msra.gmra.mxu1 %v771_v14 }
  0xe3   :  { %v855_v16 = vpop.f32.mrf.mxu0 }
  0xe4   :  { %v877_v17 = vpop.f32.mrf.mxu1 }
  0xe5   :  { %v856_v18 = vpop.f32.mrf.mxu0 }
  0xe6   :  { %v878_v19 = vpop.f32.mrf.mxu1  ;;  %v857_v21 = vadd.f32 %v856_v18, %v855_v16 }
  0xe7   :  { %v858_v20 = vpop.f32.mrf.mxu0  ;;  %v879_v26 = vadd.f32 %v878_v19, %v877_v17 }
  0xe8   :  { %v880_v22 = vpop.f32.mrf.mxu1  ;;  %v617_v25 = vadd.f32 %v857_v21, %v764_v23 }
  0xe9   :  { %v859_v24 = vpop.f32.mrf.mxu0 }
  0xea   :  { %v860_v27 = vadd.f32 %v859_v24, %v858_v20  ;;  %v881_v28 = vpop.f32.mrf.mxu1  ;;  %v658_v32 = vadd.f32 %v879_v26, %v617_v25 }
  0xeb   :  { %v882_v37 = vadd.f32 %v881_v28, %v880_v22 }
  0xec   :  { %v620_v33 = vadd.f32 %v860_v27, %v764_v23 }
  0xee   :  { %v661_v42 = vadd.f32 %v882_v37, %v620_v33 }
 0x103   :  { %v899_v29 = vpop.f32.mrf.mxu0 }
 0x104   :  { %v921_v30 = vpop.f32.mrf.mxu1 }
 0x105   :  { %v900_v31 = vpop.f32.mrf.mxu0 }
 0x106   :  { %v901_v34 = vadd.f32 %v900_v31, %v899_v29  ;;  %v922_v35 = vpop.f32.mrf.mxu1 }
 0x107   :  { %v902_v36 = vpop.f32.mrf.mxu0  ;;  %v923_v39 = vadd.f32 %v922_v35, %v921_v30 }
 0x108   :  { %v699_v38 = vadd.f32 %v901_v34, %v658_v32  ;;  %v924_v40 = vpop.f32.mrf.mxu1 }
 0x109   :  { %v903_v41 = vpop.f32.mrf.mxu0 }
 0x10a   :  { %v740_v43 = vadd.f32 %v923_v39, %v699_v38  ;;  %v904_v44 = vadd.f32 %v903_v41, %v902_v36  ;;  %v925_v45 = vpop.f32.mrf.mxu1 }
 0x10b   :  { %v926_v48 = vadd.f32 %v925_v45, %v924_v40 }
 0x10c   :  { %v746_v46 = vmin.f32 %v740_v43, 0.0  ;;  %v702_v47 = vadd.f32 %v904_v44, %v661_v42  ;;  %vm754_vm0 = vcmp.gt.f32.partialorder %v740_v43, 0.0 }
 0x10e   :  { %v748_v49 = vmul.f32 1.442695, %v746_v46  ;;  %v743_v50 = vadd.f32 %v926_v48, %v702_v47 }
 0x110   :  { %991 = vpow2.f32 %v748_v49  ;;  %v747_v51 = vmin.f32 %v743_v50, 0.0  ;;  %vm755_vm1 = vcmp.gt.f32.partialorder %v743_v50, 0.0 }
 0x112   :  { %v750_v52 = vmul.f32 1.442695, %v747_v51 }
 0x114   :  { %993 = vpow2.f32 %v750_v52 }
 0x11d   :  { %v992_v53 = vpop.eup %991 }
 0x11e   :  { %v837_v54 = vadd.f32 -1.0, %v992_v53 }
 0x120   :  { %v756_v55 = vsel %vm754_vm0, %v740_v43, %v837_v54 }
 0x121   :  { %v994_v56 = vpop.eup %993  ;;  %758 = vst [vmem:[%s1243_s3] sm:$0xff] %v756_v55 }
 0x122   :  { %v838_v57 = vadd.f32 -1.0, %v994_v56 }
 0x124   :  { %v757_v58 = vsel %vm755_vm1, %v743_v50, %v838_v57 }
 0x125   :  { %759 = vst [vmem:[%s1243_s3 + $0x8] sm:$0xff] %v757_v58 }

</bundles_post_ra>
